<compile_context>
chip_gen: v7x
topology: tpu7x:2x2x1
jax: 0.10.0
libtpu: 0.0.40
codegen_flags: <defaults>
</compile_context>

<pallas_src>
import functools

import jax
import jax.numpy as jnp
from jax.experimental import pallas as pl
from jax.experimental.pallas import tpu as pltpu


# ---------------------------------------------------------------------------
# Kernel 1: 3x3 conv (+ bias) over the WHOLE batch packed into one LHS, with
# an optional fused BatchNorm+ReLU applied to the input (used to fuse the
# previous layer's BN/ReLU into this conv's load), plus lane-dense per-channel
# sum / sum-of-squares row-partials for the following BatchNorm.
# ---------------------------------------------------------------------------
def conv3x3_bn_stats_kernel(*refs, fuse_input_bn_relu):
    if fuse_input_bn_relu:
        (x_ref, wb_ref, b_ref, scale_ref, shift_ref,
         y_ref, sum_ref, ssq_ref, xp_ref) = refs
    else:
        x_ref, wb_ref, b_ref, y_ref, sum_ref, ssq_ref, xp_ref = refs
        scale_ref = shift_ref = None

    # x_ref:     (N, H, W*Cin)        bf16 activations, channels on lanes
    # wb_ref:    (3, W*Cin, W*Cout)   bf16 banded weights (one band per dy)
    # b_ref:     (1, W*Cout)          f32 bias, tiled over W
    # scale_ref: (1, W*Cin)           f32 BN scale for the input (fused only)
    # shift_ref: (1, W*Cin)           f32 BN shift for the input (fused only)
    # y_ref:     (N, H, W*Cout)       bf16 conv output (pre-BN), lane-dense
    # sum_ref:   (1, W*Cout)          f32 lane-dense per-(w,c) sum partial
    # ssq_ref:   (1, W*Cout)          f32 lane-dense per-(w,c) sum-of-squares
    # xp_ref:    (N*(H+2), W*Cin)     bf16 VMEM scratch: batch-packed halo rows
    N, H, WCI = x_ref.shape
    WCO = y_ref.shape[-1]
    Hp = H + 2
    M = N * Hp - 2                    # rows fed to each dy matmul

    # ---- pack the whole batch into one halo-padded bf16 LHS (1 cast max) ----
    zrow = jnp.zeros((1, WCI), xp_ref.dtype)
    for n in range(N):                # static unroll; N is small per block
        xp_ref[pl.ds(n * Hp, 1), :] = zrow               # top halo (zero pad)
        xp_ref[pl.ds(n * Hp + H + 1, 1), :] = zrow       # bottom halo
        if fuse_input_bn_relu:
            x = x_ref[n].astype(jnp.float32)
            x = jnp.maximum(x * scale_ref[...] + shift_ref[...], 0.0)
            xp_ref[pl.ds(n * Hp + 1, H), :] = x.astype(xp_ref.dtype)
        else:
            xp_ref[pl.ds(n * Hp + 1, H), :] = x_ref[n]   # straight bf16 copy

    # ---- 3 MXU matmuls (K = W*Cin) over the packed batch; dx taps and the
    # zero padding along W live in the banded weights.  bf16 x bf16 -> f32. ----
    acc = jnp.zeros((M, WCO), jnp.float32)
    for dy in range(3):
        acc = acc + jnp.dot(xp_ref[pl.ds(dy, M), :], wb_ref[dy],
                            preferred_element_type=jnp.float32)
    acc = acc + b_ref[...]                               # bias (tiled over W)

    # ---- store valid rows per image + lane-dense BN statistic partials.
    # Rows between images in `acc` are cross-image garbage and are skipped.
    # Stats are taken on the bf16-rounded values the next stage reads back. ----
    s = jnp.zeros((1, WCO), jnp.float32)
    q = jnp.zeros((1, WCO), jnp.float32)
    for n in range(N):
        blk = acc[n * Hp:n * Hp + H, :]                  # (H, W*Cout) valid
        yb = blk.astype(y_ref.dtype)
        y_ref[n] = yb                                    # lane-dense store
        b32 = yb.astype(jnp.float32)
        s = s + jnp.sum(b32, axis=0, keepdims=True)      # row-sum only: no XLU
        q = q + jnp.sum(b32 * b32, axis=0, keepdims=True)
    sum_ref[...] = s
    ssq_ref[...] = q


# ---------------------------------------------------------------------------
# Kernel 2: final BatchNorm (precomputed scale/shift) + ReLU, lane-dense,
# one grid step per batch element ("parallel" -> megacore-shardable, pipelined).
# ---------------------------------------------------------------------------
def bn_relu_kernel(y_ref, scale_ref, shift_ref, o_ref):
    # y_ref: (1, H, W*C) bf16; scale/shift: (1, W*C) f32; o_ref: (1, H, W*C) bf16
    WC = y_ref.shape[-1]
    y = y_ref[...].astype(jnp.float32)
    scale = scale_ref[...].reshape(1, 1, WC)
    shift = shift_ref[...].reshape(1, 1, WC)
    o_ref[...] = jnp.maximum(y * scale + shift, 0.0).astype(o_ref.dtype)


# ---------------------------------------------------------------------------
# pallas_call wrappers
# ---------------------------------------------------------------------------
def conv3x3_bn_stats(x_rows, wb, bias_t, scale_t=None, shift_t=None):
    """x_rows: (N, H, W*Cin) bf16.  Returns bf16 conv output (N, H, W*Cout)
    plus f32 lane-dense (1, W*Cout) sum / sum-of-squares partials."""
    N, H, WCI = x_rows.shape
    WCO = wb.shape[-1]
    fused = scale_t is not None

    kernel = functools.partial(conv3x3_bn_stats_kernel,
                               fuse_input_bn_relu=fused)

    in_specs = [
        pl.BlockSpec((N, H, WCI), lambda i: (0, 0, 0)),
        pl.BlockSpec((3, WCI, WCO), lambda i: (0, 0, 0)),
        pl.BlockSpec((1, WCO), lambda i: (0, 0)),
    ]
    operands = [x_rows, wb, bias_t]
    if fused:
        in_specs += [pl.BlockSpec((1, WCI), lambda i: (0, 0)),
                     pl.BlockSpec((1, WCI), lambda i: (0, 0))]
        operands += [scale_t, shift_t]

    # At real sizes: add (batch-pack, row-tile) grid axes, single-buffer the
    # grid-invariant weight block, and set vmem_limit_bytes for the target
    # generation (budget against 64 MiB on v7x, 128 MiB on v5e/v6e).
    y, s, q = pl.pallas_call(
        kernel,
        out_shape=(
            jax.ShapeDtypeStruct((N, H, WCO), jnp.bfloat16),
            jax.ShapeDtypeStruct((1, WCO), jnp.float32),
            jax.ShapeDtypeStruct((1, WCO), jnp.float32),
        ),
        grid=(1,),
        in_specs=in_specs,
        out_specs=(
            pl.BlockSpec((N, H, WCO), lambda i: (0, 0, 0)),
            pl.BlockSpec((1, WCO), lambda i: (0, 0)),
            pl.BlockSpec((1, WCO), lambda i: (0, 0)),
        ),
        scratch_shapes=[pltpu.VMEM((N * (H + 2), WCI), jnp.bfloat16)],
        compiler_params=pltpu.CompilerParams(
            dimension_semantics=("arbitrary",)),
    )(*operands)
    return y, s, q


def bn_relu(y_rows, scale_t, shift_t):
    """y_rows: (N, H, W*C) bf16 -> bf16 output, one pipelined grid step per n."""
    N, H, WC = y_rows.shape
    return pl.pallas_call(
        bn_relu_kernel,
        out_shape=jax.ShapeDtypeStruct((N, H, WC), jnp.bfloat16),
        grid=(N,),
        in_specs=[
            pl.BlockSpec((1, H, WC), lambda n: (n, 0, 0)),
            pl.BlockSpec((1, WC), lambda n: (0, 0)),
            pl.BlockSpec((1, WC), lambda n: (0, 0)),
        ],
        out_specs=pl.BlockSpec((1, H, WC), lambda n: (n, 0, 0)),
        compiler_params=pltpu.CompilerParams(
            dimension_semantics=("parallel",)),
    )(y_rows, scale_t, shift_t)


# ---------------------------------------------------------------------------
# Wrapper-side helpers (tiny, run in XLA)
# ---------------------------------------------------------------------------
def build_banded_weights(w_hwio, W):
    """(3, 3, Cin, Cout) HWIO -> (3, W*Cin, W*Cout) banded matrices.
    banded[dy][wi*Cin+ci, wo*Cout+co] = w[dy, dx, ci, co] with wi = wo+dx-1,
    zero outside the valid range (encodes dx taps AND zero padding along W).
    Fine at toy W; for real VGG W use a per-tap shifted-LHS scheme instead."""
    kh, kw, cin, cout = w_hwio.shape
    wi = jnp.arange(W)
    wo = jnp.arange(W)
    dx = jnp.arange(kw)
    mask = (wi[None, :, None] ==
            (wo[None, None, :] + dx[:, None, None] - 1)).astype(w_hwio.dtype)
    wb = jnp.einsum("kio,dkcz->dicoz", mask, w_hwio)     # (kh, W, cin, W, cout)
    return wb.reshape(kh, W * cin, W * cout)


def bn_scale_shift(sum_t, ssq_t, gamma, beta, count, W, eps=1e-5):
    """Fold lane-dense (1, W*C) partials over W and build training-mode
    BatchNorm affine params, tiled back to (1, W*C) for the fused kernels."""
    C = gamma.shape[0]
    s = jnp.sum(sum_t.reshape(W, C), axis=0)
    q = jnp.sum(ssq_t.reshape(W, C), axis=0)
    mean = s / count
    # E[x^2]-E[x]^2 in f32, clamped; use centered/Welford partials at real counts.
    var = jnp.maximum(q / count - mean * mean, 0.0)
    scale = gamma * jax.lax.rsqrt(var + eps)
    shift = beta - mean * scale
    return (jnp.tile(scale, W)[None, :].astype(jnp.float32),
            jnp.tile(shift, W)[None, :].astype(jnp.float32))


# ---------------------------------------------------------------------------
# Full VGGBlock forward (NCHW in / NCHW out, like the PyTorch module)
# ---------------------------------------------------------------------------
@jax.jit
def vgg_block_forward(x_nchw, params):
    N, Cin, H, W = x_nchw.shape
    Cmid = params["w1"].shape[-1]
    Cout = params["w2"].shape[-1]
    count = N * H * W

    # NCHW -> channels-folded row layout (N, H, W*Cin), bf16 at the boundary.
    x_rows = jnp.transpose(x_nchw, (0, 2, 3, 1)).reshape(
        N, H, W * Cin).astype(jnp.bfloat16)

    # ---- conv1 (+ lane-dense BN stats) ----
    wb1 = build_banded_weights(params["w1"], W).astype(jnp.bfloat16)
    b1_t = jnp.tile(params["b1"], W)[None, :].astype(jnp.float32)
    y1, s1, q1 = conv3x3_bn_stats(x_rows, wb1, b1_t)
    scale1_t, shift1_t = bn_scale_shift(s1, q1, params["gamma1"],
                                        params["beta1"], count, W)

    # ---- conv2 with BN1 + ReLU fused into its input load ----
    wb2 = build_banded_weights(params["w2"], W).astype(jnp.bfloat16)
    b2_t = jnp.tile(params["b2"], W)[None, :].astype(jnp.float32)
    y2, s2, q2 = conv3x3_bn_stats(y1, wb2, b2_t, scale1_t, shift1_t)
    scale2_t, shift2_t = bn_scale_shift(s2, q2, params["gamma2"],
                                        params["beta2"], count, W)

    # ---- final BN2 + ReLU (pipelined, batch-parallel, bf16 writeback) ----
    out_rows = bn_relu(y2, scale2_t, shift2_t)            # (N, H, W*Cout) bf16
    out = jnp.transpose(out_rows.reshape(N, H, W, Cout), (0, 3, 1, 2))
    return out.astype(jnp.float32)


# ---------------------------------------------------------------------------
# Pure-JAX f32 reference (same semantics) for a sanity check
# ---------------------------------------------------------------------------
def ref_forward(x_nchw, params, eps=1e-5):
    x = jnp.transpose(x_nchw, (0, 2, 3, 1))

    def conv(x, w, b):
        return jax.lax.conv_general_dilated(
            x, w, (1, 1), "SAME",
            dimension_numbers=("NHWC", "HWIO", "NHWC")) + b

    def bnr(y, g, b):
        m = jnp.mean(y, axis=(0, 1, 2))
        v = jnp.mean((y - m) ** 2, axis=(0, 1, 2))
        return jnp.maximum((y - m) / jnp.sqrt(v + eps) * g + b, 0.0)

    h = bnr(conv(x, params["w1"], params["b1"]), params["gamma1"], params["beta1"])
    h = bnr(conv(h, params["w2"], params["b2"]), params["gamma2"], params["beta2"])
    return jnp.transpose(h, (0, 3, 1, 2))


def init_params(key, in_ch, mid_ch, out_ch):
    k1, k2, k3, k4 = jax.random.split(key, 4)
    # PyTorch conv weights are OIHW; convert to HWIO.
    w1_oihw = 0.1 * jax.random.normal(k1, (mid_ch, in_ch, 3, 3), jnp.float32)
    w2_oihw = 0.1 * jax.random.normal(k2, (out_ch, mid_ch, 3, 3), jnp.float32)
    return {
        "w1": jnp.transpose(w1_oihw, (2, 3, 1, 0)),
        "b1": 0.01 * jax.random.normal(k3, (mid_ch,), jnp.float32),
        "gamma1": jnp.ones((mid_ch,), jnp.float32),
        "beta1": jnp.zeros((mid_ch,), jnp.float32),
        "w2": jnp.transpose(w2_oihw, (2, 3, 1, 0)),
        "b2": 0.01 * jax.random.normal(k4, (out_ch,), jnp.float32),
        "gamma2": jnp.ones((out_ch,), jnp.float32),
        "beta2": jnp.zeros((out_ch,), jnp.float32),
    }


if __name__ == "__main__":
    key = jax.random.PRNGKey(0)
    kx, kp = jax.random.split(key)

    N, Cin, Cmid, Cout, H, W = 2, 4, 8, 8, 16, 16
    x = jax.random.normal(kx, (N, Cin, H, W), jnp.float32)   # NCHW like PyTorch
    params = init_params(kp, Cin, Cmid, Cout)

    out = jax.block_until_ready(vgg_block_forward(x, params))
    assert out.shape == (N, Cout, H, W), out.shape

    ref = ref_forward(x, params)
    assert bool(jnp.all(jnp.isfinite(out)))
    max_err = float(jnp.max(jnp.abs(out - ref)))
    # bf16 matmul operands + bf16 intermediates/output vs f32 reference.
    assert bool(jnp.allclose(out, ref, atol=5e-2, rtol=5e-2)), max_err

    print("KERNEL_OK")
</pallas_src>

<mosaic_0001>
module attributes {stable_mosaic.version = 11 : i64} {
  func.func @conv3x3_bn_stats_kernel(%arg0: i32, %arg1: memref<2x16x64xbf16, #tpu.memory_space<vmem>>, %arg2: memref<3x64x128xbf16, #tpu.memory_space<vmem>>, %arg3: memref<1x128xf32, #tpu.memory_space<vmem>>, %arg4: memref<2x16x128xbf16, #tpu.memory_space<vmem>>, %arg5: memref<1x128xf32, #tpu.memory_space<vmem>>, %arg6: memref<1x128xf32, #tpu.memory_space<vmem>>, %arg7: memref<36x64xbf16, #tpu.memory_space<vmem>>) attributes {dimension_semantics = [#tpu.dimension_semantics<arbitrary>], iteration_bounds = array<i64: 1>, scalar_prefetch = 0 : i64, scratch_operands = 1 : i64, tpu.core_type = #tpu.core_type<tc>, window_params = [{pipeline_mode = #tpu.pipeline_mode<synchronous>, transform_indices = @transform_0, window_bounds = array<i64: 2, 16, 64>}, {pipeline_mode = #tpu.pipeline_mode<synchronous>, transform_indices = @transform_1, window_bounds = array<i64: 3, 64, 128>}, {pipeline_mode = #tpu.pipeline_mode<synchronous>, transform_indices = @transform_2, window_bounds = array<i64: 1, 128>}, {pipeline_mode = #tpu.pipeline_mode<synchronous>, transform_indices = @transform_3, window_bounds = array<i64: 2, 16, 128>}, {pipeline_mode = #tpu.pipeline_mode<synchronous>, transform_indices = @transform_4, window_bounds = array<i64: 1, 128>}, {pipeline_mode = #tpu.pipeline_mode<synchronous>, transform_indices = @transform_5, window_bounds = array<i64: 1, 128>}]} {
    %cst = arith.constant 0.000000e+00 : bf16
    %0 = vector.broadcast %cst : bf16 to vector<1x64xbf16>
    %c0 = arith.constant 0 : index
    %c0_0 = arith.constant 0 : index
    %1 = vector.load %arg7[%c0, %c0_0] : memref<36x64xbf16, #tpu.memory_space<vmem>>, vector<1x64xbf16>
    tpu.vector_store %arg7[%c0, %c0_0], %0 {strides = array<i32>} : memref<36x64xbf16, #tpu.memory_space<vmem>>, vector<1x64xbf16>,
    %c17 = arith.constant 17 : index
    %c0_1 = arith.constant 0 : index
    %2 = vector.load %arg7[%c17, %c0_1] : memref<36x64xbf16, #tpu.memory_space<vmem>>, vector<1x64xbf16>
    tpu.vector_store %arg7[%c17, %c0_1], %0 {strides = array<i32>} : memref<36x64xbf16, #tpu.memory_space<vmem>>, vector<1x64xbf16>,
    %c0_2 = arith.constant 0 : index
    %c0_3 = arith.constant 0 : index
    %c0_4 = arith.constant 0 : index
    %3 = vector.load %arg1[%c0_2, %c0_3, %c0_4] : memref<2x16x64xbf16, #tpu.memory_space<vmem>>, vector<1x16x64xbf16>
    %4 = vector.shape_cast %3 : vector<1x16x64xbf16> to vector<16x64xbf16>
    %c1 = arith.constant 1 : index
    %c0_5 = arith.constant 0 : index
    %5 = vector.load %arg7[%c1, %c0_5] : memref<36x64xbf16, #tpu.memory_space<vmem>>, vector<16x64xbf16>
    tpu.vector_store %arg7[%c1, %c0_5], %4 {strides = array<i32>} : memref<36x64xbf16, #tpu.memory_space<vmem>>, vector<16x64xbf16>,
    %c18 = arith.constant 18 : index
    %c0_6 = arith.constant 0 : index
    %6 = vector.load %arg7[%c18, %c0_6] : memref<36x64xbf16, #tpu.memory_space<vmem>>, vector<1x64xbf16>
    tpu.vector_store %arg7[%c18, %c0_6], %0 {strides = array<i32>} : memref<36x64xbf16, #tpu.memory_space<vmem>>, vector<1x64xbf16>,
    %c35 = arith.constant 35 : index
    %c0_7 = arith.constant 0 : index
    %7 = vector.load %arg7[%c35, %c0_7] : memref<36x64xbf16, #tpu.memory_space<vmem>>, vector<1x64xbf16>
    tpu.vector_store %arg7[%c35, %c0_7], %0 {strides = array<i32>} : memref<36x64xbf16, #tpu.memory_space<vmem>>, vector<1x64xbf16>,
    %c1_8 = arith.constant 1 : index
    %c0_9 = arith.constant 0 : index
    %c0_10 = arith.constant 0 : index
    %8 = vector.load %arg1[%c1_8, %c0_9, %c0_10] : memref<2x16x64xbf16, #tpu.memory_space<vmem>>, vector<1x16x64xbf16>
    %9 = vector.shape_cast %8 : vector<1x16x64xbf16> to vector<16x64xbf16>
    %c19 = arith.constant 19 : index
    %c0_11 = arith.constant 0 : index
    %10 = vector.load %arg7[%c19, %c0_11] : memref<36x64xbf16, #tpu.memory_space<vmem>>, vector<16x64xbf16>
    tpu.vector_store %arg7[%c19, %c0_11], %9 {strides = array<i32>} : memref<36x64xbf16, #tpu.memory_space<vmem>>, vector<16x64xbf16>,
    %cst_12 = arith.constant 0.000000e+00 : f32
    %11 = vector.broadcast %cst_12 : f32 to vector<34x128xf32>
    %c0_13 = arith.constant 0 : index
    %c0_14 = arith.constant 0 : index
    %12 = vector.load %arg7[%c0_13, %c0_14] : memref<36x64xbf16, #tpu.memory_space<vmem>>, vector<34x64xbf16>
    %c0_15 = arith.constant 0 : index
    %c0_16 = arith.constant 0 : index
    %c0_17 = arith.constant 0 : index
    %13 = vector.load %arg2[%c0_15, %c0_16, %c0_17] : memref<3x64x128xbf16, #tpu.memory_space<vmem>>, vector<1x64x128xbf16>
    %14 = vector.shape_cast %13 : vector<1x64x128xbf16> to vector<64x128xbf16>
    %cst_18 = arith.constant dense<0.000000e+00> : vector<34x128xf32>
    %15 = tpu.matmul %12, %14, %cst_18 {dimension_numbers = #tpu.dot_dimension_numbers<[1], [0], [0], [1], [0, 0, 1, 1], [], []>} : vector<34x64xbf16>, vector<64x128xbf16>, vector<34x128xf32> -> vector<34x128xf32>
    %16 = arith.addf %11, %15 : vector<34x128xf32>
    %c1_19 = arith.constant 1 : index
    %c0_20 = arith.constant 0 : index
    %17 = vector.load %arg7[%c1_19, %c0_20] : memref<36x64xbf16, #tpu.memory_space<vmem>>, vector<34x64xbf16>
    %c1_21 = arith.constant 1 : index
    %c0_22 = arith.constant 0 : index
    %c0_23 = arith.constant 0 : index
    %18 = vector.load %arg2[%c1_21, %c0_22, %c0_23] : memref<3x64x128xbf16, #tpu.memory_space<vmem>>, vector<1x64x128xbf16>
    %19 = vector.shape_cast %18 : vector<1x64x128xbf16> to vector<64x128xbf16>
    %cst_24 = arith.constant dense<0.000000e+00> : vector<34x128xf32>
    %20 = tpu.matmul %17, %19, %cst_24 {dimension_numbers = #tpu.dot_dimension_numbers<[1], [0], [0], [1], [0, 0, 1, 1], [], []>} : vector<34x64xbf16>, vector<64x128xbf16>, vector<34x128xf32> -> vector<34x128xf32>
    %21 = arith.addf %16, %20 : vector<34x128xf32>
    %c2 = arith.constant 2 : index
    %c0_25 = arith.constant 0 : index
    %22 = vector.load %arg7[%c2, %c0_25] : memref<36x64xbf16, #tpu.memory_space<vmem>>, vector<34x64xbf16>
    %c2_26 = arith.constant 2 : index
    %c0_27 = arith.constant 0 : index
    %c0_28 = arith.constant 0 : index
    %23 = vector.load %arg2[%c2_26, %c0_27, %c0_28] : memref<3x64x128xbf16, #tpu.memory_space<vmem>>, vector<1x64x128xbf16>
    %24 = vector.shape_cast %23 : vector<1x64x128xbf16> to vector<64x128xbf16>
    %cst_29 = arith.constant dense<0.000000e+00> : vector<34x128xf32>
    %25 = tpu.matmul %22, %24, %cst_29 {dimension_numbers = #tpu.dot_dimension_numbers<[1], [0], [0], [1], [0, 0, 1, 1], [], []>} : vector<34x64xbf16>, vector<64x128xbf16>, vector<34x128xf32> -> vector<34x128xf32>
    %26 = arith.addf %21, %25 : vector<34x128xf32>
    %c0_30 = arith.constant 0 : index
    %c0_31 = arith.constant 0 : index
    %27 = vector.load %arg3[%c0_30, %c0_31] : memref<1x128xf32, #tpu.memory_space<vmem>>, vector<1x128xf32>
    %28 = vector.broadcast %27 : vector<1x128xf32> to vector<34x128xf32>
    %29 = arith.addf %26, %28 : vector<34x128xf32>
    %cst_32 = arith.constant 0.000000e+00 : f32
    %30 = vector.broadcast %cst_32 : f32 to vector<1x128xf32>
    %cst_33 = arith.constant 0.000000e+00 : f32
    %31 = vector.broadcast %cst_33 : f32 to vector<1x128xf32>
    %32 = vector.extract_strided_slice %29 {offsets = [0, 0], sizes = [16, 128], strides = [1, 1]} : vector<34x128xf32> to vector<16x128xf32>
    %33 = arith.truncf %32 : vector<16x128xf32> to vector<16x128xbf16>
    %c0_34 = arith.constant 0 : index
    %c0_35 = arith.constant 0 : index
    %c0_36 = arith.constant 0 : index
    %34 = vector.load %arg4[%c0_34, %c0_35, %c0_36] : memref<2x16x128xbf16, #tpu.memory_space<vmem>>, vector<1x16x128xbf16>
    %35 = vector.shape_cast %34 : vector<1x16x128xbf16> to vector<16x128xbf16>
    %36 = vector.shape_cast %33 : vector<16x128xbf16> to vector<1x16x128xbf16>
    tpu.vector_store %arg4[%c0_34, %c0_35, %c0_36], %36 {strides = array<i32>} : memref<2x16x128xbf16, #tpu.memory_space<vmem>>, vector<1x16x128xbf16>,
    %37 = arith.extf %33 : vector<16x128xbf16> to vector<16x128xf32>
    %cst_37 = arith.constant dense<0.000000e+00> : vector<128xf32>
    %38 = vector.multi_reduction <add>, %37, %cst_37 [0] : vector<16x128xf32> to vector<128xf32>
    %39 = vector.shape_cast %38 : vector<128xf32> to vector<1x128xf32>
    %40 = arith.addf %30, %39 : vector<1x128xf32>
    %41 = arith.mulf %37, %37 : vector<16x128xf32>
    %cst_38 = arith.constant dense<0.000000e+00> : vector<128xf32>
    %42 = vector.multi_reduction <add>, %41, %cst_38 [0] : vector<16x128xf32> to vector<128xf32>
    %43 = vector.shape_cast %42 : vector<128xf32> to vector<1x128xf32>
    %44 = arith.addf %31, %43 : vector<1x128xf32>
    %45 = vector.extract_strided_slice %29 {offsets = [18, 0], sizes = [16, 128], strides = [1, 1]} : vector<34x128xf32> to vector<16x128xf32>
    %46 = arith.truncf %45 : vector<16x128xf32> to vector<16x128xbf16>
    %c1_39 = arith.constant 1 : index
    %c0_40 = arith.constant 0 : index
    %c0_41 = arith.constant 0 : index
    %47 = vector.load %arg4[%c1_39, %c0_40, %c0_41] : memref<2x16x128xbf16, #tpu.memory_space<vmem>>, vector<1x16x128xbf16>
    %48 = vector.shape_cast %47 : vector<1x16x128xbf16> to vector<16x128xbf16>
    %49 = vector.shape_cast %46 : vector<16x128xbf16> to vector<1x16x128xbf16>
    tpu.vector_store %arg4[%c1_39, %c0_40, %c0_41], %49 {strides = array<i32>} : memref<2x16x128xbf16, #tpu.memory_space<vmem>>, vector<1x16x128xbf16>,
    %50 = arith.extf %46 : vector<16x128xbf16> to vector<16x128xf32>
    %cst_42 = arith.constant dense<0.000000e+00> : vector<128xf32>
    %51 = vector.multi_reduction <add>, %50, %cst_42 [0] : vector<16x128xf32> to vector<128xf32>
    %52 = vector.shape_cast %51 : vector<128xf32> to vector<1x128xf32>
    %53 = arith.addf %40, %52 : vector<1x128xf32>
    %54 = arith.mulf %50, %50 : vector<16x128xf32>
    %cst_43 = arith.constant dense<0.000000e+00> : vector<128xf32>
    %55 = vector.multi_reduction <add>, %54, %cst_43 [0] : vector<16x128xf32> to vector<128xf32>
    %56 = vector.shape_cast %55 : vector<128xf32> to vector<1x128xf32>
    %57 = arith.addf %44, %56 : vector<1x128xf32>
    %c0_44 = arith.constant 0 : index
    %c0_45 = arith.constant 0 : index
    %58 = vector.load %arg5[%c0_44, %c0_45] : memref<1x128xf32, #tpu.memory_space<vmem>>, vector<1x128xf32>
    tpu.vector_store %arg5[%c0_44, %c0_45], %53 {strides = array<i32>} : memref<1x128xf32, #tpu.memory_space<vmem>>, vector<1x128xf32>,
    %c0_46 = arith.constant 0 : index
    %c0_47 = arith.constant 0 : index
    %59 = vector.load %arg6[%c0_46, %c0_47] : memref<1x128xf32, #tpu.memory_space<vmem>>, vector<1x128xf32>
    tpu.vector_store %arg6[%c0_46, %c0_47], %57 {strides = array<i32>} : memref<1x128xf32, #tpu.memory_space<vmem>>, vector<1x128xf32>,
    return
  }
  func.func @transform_0(%arg0: i32) -> (i32, i32, i32) {
    %c0_i32 = arith.constant 0 : i32
    %c0_i32_0 = arith.constant 0 : i32
    %c0_i32_1 = arith.constant 0 : i32
    %c0_i32_2 = arith.constant 0 : i32
    return %c0_i32, %c0_i32_0, %c0_i32_1 : i32, i32, i32
  }
  func.func @transform_1(%arg0: i32) -> (i32, i32, i32) {
    %c0_i32 = arith.constant 0 : i32
    %c0_i32_0 = arith.constant 0 : i32
    %c0_i32_1 = arith.constant 0 : i32
    %c0_i32_2 = arith.constant 0 : i32
    return %c0_i32, %c0_i32_0, %c0_i32_1 : i32, i32, i32
  }
  func.func @transform_2(%arg0: i32) -> (i32, i32) {
    %c0_i32 = arith.constant 0 : i32
    %c0_i32_0 = arith.constant 0 : i32
    %c0_i32_1 = arith.constant 0 : i32
    return %c0_i32, %c0_i32_0 : i32, i32
  }
  func.func @transform_3(%arg0: i32) -> (i32, i32, i32) {
    %c0_i32 = arith.constant 0 : i32
    %c0_i32_0 = arith.constant 0 : i32
    %c0_i32_1 = arith.constant 0 : i32
    %c0_i32_2 = arith.constant 0 : i32
    return %c0_i32, %c0_i32_0, %c0_i32_1 : i32, i32, i32
  }
  func.func @transform_4(%arg0: i32) -> (i32, i32) {
    %c0_i32 = arith.constant 0 : i32
    %c0_i32_0 = arith.constant 0 : i32
    %c0_i32_1 = arith.constant 0 : i32
    return %c0_i32, %c0_i32_0 : i32, i32
  }
  func.func @transform_5(%arg0: i32) -> (i32, i32) {
    %c0_i32 = arith.constant 0 : i32
    %c0_i32_0 = arith.constant 0 : i32
    %c0_i32_1 = arith.constant 0 : i32
    return %c0_i32, %c0_i32_0 : i32, i32
  }
}

module attributes {stable_mosaic.version = 11 : i64} {
  func.func @conv3x3_bn_stats_kernel(%arg0: i32, %arg1: memref<2x16x128xbf16, #tpu.memory_space<vmem>>, %arg2: memref<3x128x128xbf16, #tpu.memory_space<vmem>>, %arg3: memref<1x128xf32, #tpu.memory_space<vmem>>, %arg4: memref<1x128xf32, #tpu.memory_space<vmem>>, %arg5: memref<1x128xf32, #tpu.memory_space<vmem>>, %arg6: memref<2x16x128xbf16, #tpu.memory_space<vmem>>, %arg7: memref<1x128xf32, #tpu.memory_space<vmem>>, %arg8: memref<1x128xf32, #tpu.memory_space<vmem>>, %arg9: memref<36x128xbf16, #tpu.memory_space<vmem>>) attributes {dimension_semantics = [#tpu.dimension_semantics<arbitrary>], iteration_bounds = array<i64: 1>, scalar_prefetch = 0 : i64, scratch_operands = 1 : i64, tpu.core_type = #tpu.core_type<tc>, window_params = [{pipeline_mode = #tpu.pipeline_mode<synchronous>, transform_indices = @transform_0, window_bounds = array<i64: 2, 16, 128>}, {pipeline_mode = #tpu.pipeline_mode<synchronous>, transform_indices = @transform_1, window_bounds = array<i64: 3, 128, 128>}, {pipeline_mode = #tpu.pipeline_mode<synchronous>, transform_indices = @transform_2, window_bounds = array<i64: 1, 128>}, {pipeline_mode = #tpu.pipeline_mode<synchronous>, transform_indices = @transform_3, window_bounds = array<i64: 1, 128>}, {pipeline_mode = #tpu.pipeline_mode<synchronous>, transform_indices = @transform_4, window_bounds = array<i64: 1, 128>}, {pipeline_mode = #tpu.pipeline_mode<synchronous>, transform_indices = @transform_5, window_bounds = array<i64: 2, 16, 128>}, {pipeline_mode = #tpu.pipeline_mode<synchronous>, transform_indices = @transform_6, window_bounds = array<i64: 1, 128>}, {pipeline_mode = #tpu.pipeline_mode<synchronous>, transform_indices = @transform_7, window_bounds = array<i64: 1, 128>}]} {
    %cst = arith.constant 0.000000e+00 : bf16
    %0 = vector.broadcast %cst : bf16 to vector<1x128xbf16>
    %c0 = arith.constant 0 : index
    %c0_0 = arith.constant 0 : index
    %1 = vector.load %arg9[%c0, %c0_0] : memref<36x128xbf16, #tpu.memory_space<vmem>>, vector<1x128xbf16>
    tpu.vector_store %arg9[%c0, %c0_0], %0 {strides = array<i32>} : memref<36x128xbf16, #tpu.memory_space<vmem>>, vector<1x128xbf16>,
    %c17 = arith.constant 17 : index
    %c0_1 = arith.constant 0 : index
    %2 = vector.load %arg9[%c17, %c0_1] : memref<36x128xbf16, #tpu.memory_space<vmem>>, vector<1x128xbf16>
    tpu.vector_store %arg9[%c17, %c0_1], %0 {strides = array<i32>} : memref<36x128xbf16, #tpu.memory_space<vmem>>, vector<1x128xbf16>,
    %c0_2 = arith.constant 0 : index
    %c0_3 = arith.constant 0 : index
    %c0_4 = arith.constant 0 : index
    %3 = vector.load %arg1[%c0_2, %c0_3, %c0_4] : memref<2x16x128xbf16, #tpu.memory_space<vmem>>, vector<1x16x128xbf16>
    %4 = vector.shape_cast %3 : vector<1x16x128xbf16> to vector<16x128xbf16>
    %5 = arith.extf %4 : vector<16x128xbf16> to vector<16x128xf32>
    %c0_5 = arith.constant 0 : index
    %c0_6 = arith.constant 0 : index
    %6 = vector.load %arg4[%c0_5, %c0_6] : memref<1x128xf32, #tpu.memory_space<vmem>>, vector<1x128xf32>
    %7 = vector.broadcast %6 : vector<1x128xf32> to vector<16x128xf32>
    %8 = arith.mulf %5, %7 : vector<16x128xf32>
    %c0_7 = arith.constant 0 : index
    %c0_8 = arith.constant 0 : index
    %9 = vector.load %arg5[%c0_7, %c0_8] : memref<1x128xf32, #tpu.memory_space<vmem>>, vector<1x128xf32>
    %10 = vector.broadcast %9 : vector<1x128xf32> to vector<16x128xf32>
    %11 = arith.addf %8, %10 : vector<16x128xf32>
    %cst_9 = arith.constant 0.000000e+00 : f32
    %12 = vector.broadcast %cst_9 : f32 to vector<16x128xf32>
    %13 = arith.maximumf %11, %12 : vector<16x128xf32>
    %14 = arith.truncf %13 : vector<16x128xf32> to vector<16x128xbf16>
    %c1 = arith.constant 1 : index
    %c0_10 = arith.constant 0 : index
    %15 = vector.load %arg9[%c1, %c0_10] : memref<36x128xbf16, #tpu.memory_space<vmem>>, vector<16x128xbf16>
    tpu.vector_store %arg9[%c1, %c0_10], %14 {strides = array<i32>} : memref<36x128xbf16, #tpu.memory_space<vmem>>, vector<16x128xbf16>,
    %c18 = arith.constant 18 : index
    %c0_11 = arith.constant 0 : index
    %16 = vector.load %arg9[%c18, %c0_11] : memref<36x128xbf16, #tpu.memory_space<vmem>>, vector<1x128xbf16>
    tpu.vector_store %arg9[%c18, %c0_11], %0 {strides = array<i32>} : memref<36x128xbf16, #tpu.memory_space<vmem>>, vector<1x128xbf16>,
    %c35 = arith.constant 35 : index
    %c0_12 = arith.constant 0 : index
    %17 = vector.load %arg9[%c35, %c0_12] : memref<36x128xbf16, #tpu.memory_space<vmem>>, vector<1x128xbf16>
    tpu.vector_store %arg9[%c35, %c0_12], %0 {strides = array<i32>} : memref<36x128xbf16, #tpu.memory_space<vmem>>, vector<1x128xbf16>,
    %c1_13 = arith.constant 1 : index
    %c0_14 = arith.constant 0 : index
    %c0_15 = arith.constant 0 : index
    %18 = vector.load %arg1[%c1_13, %c0_14, %c0_15] : memref<2x16x128xbf16, #tpu.memory_space<vmem>>, vector<1x16x128xbf16>
    %19 = vector.shape_cast %18 : vector<1x16x128xbf16> to vector<16x128xbf16>
    %20 = arith.extf %19 : vector<16x128xbf16> to vector<16x128xf32>
    %c0_16 = arith.constant 0 : index
    %c0_17 = arith.constant 0 : index
    %21 = vector.load %arg4[%c0_16, %c0_17] : memref<1x128xf32, #tpu.memory_space<vmem>>, vector<1x128xf32>
    %22 = vector.broadcast %21 : vector<1x128xf32> to vector<16x128xf32>
    %23 = arith.mulf %20, %22 : vector<16x128xf32>
    %c0_18 = arith.constant 0 : index
    %c0_19 = arith.constant 0 : index
    %24 = vector.load %arg5[%c0_18, %c0_19] : memref<1x128xf32, #tpu.memory_space<vmem>>, vector<1x128xf32>
    %25 = vector.broadcast %24 : vector<1x128xf32> to vector<16x128xf32>
    %26 = arith.addf %23, %25 : vector<16x128xf32>
    %cst_20 = arith.constant 0.000000e+00 : f32
    %27 = vector.broadcast %cst_20 : f32 to vector<16x128xf32>
    %28 = arith.maximumf %26, %27 : vector<16x128xf32>
    %29 = arith.truncf %28 : vector<16x128xf32> to vector<16x128xbf16>
    %c19 = arith.constant 19 : index
    %c0_21 = arith.constant 0 : index
    %30 = vector.load %arg9[%c19, %c0_21] : memref<36x128xbf16, #tpu.memory_space<vmem>>, vector<16x128xbf16>
    tpu.vector_store %arg9[%c19, %c0_21], %29 {strides = array<i32>} : memref<36x128xbf16, #tpu.memory_space<vmem>>, vector<16x128xbf16>,
    %cst_22 = arith.constant 0.000000e+00 : f32
    %31 = vector.broadcast %cst_22 : f32 to vector<34x128xf32>
    %c0_23 = arith.constant 0 : index
    %c0_24 = arith.constant 0 : index
    %32 = vector.load %arg9[%c0_23, %c0_24] : memref<36x128xbf16, #tpu.memory_space<vmem>>, vector<34x128xbf16>
    %c0_25 = arith.constant 0 : index
    %c0_26 = arith.constant 0 : index
    %c0_27 = arith.constant 0 : index
    %33 = vector.load %arg2[%c0_25, %c0_26, %c0_27] : memref<3x128x128xbf16, #tpu.memory_space<vmem>>, vector<1x128x128xbf16>
    %34 = vector.shape_cast %33 : vector<1x128x128xbf16> to vector<128x128xbf16>
    %cst_28 = arith.constant dense<0.000000e+00> : vector<34x128xf32>
    %35 = tpu.matmul %32, %34, %cst_28 {dimension_numbers = #tpu.dot_dimension_numbers<[1], [0], [0], [1], [0, 0, 1, 1], [], []>} : vector<34x128xbf16>, vector<128x128xbf16>, vector<34x128xf32> -> vector<34x128xf32>
    %36 = arith.addf %31, %35 : vector<34x128xf32>
    %c1_29 = arith.constant 1 : index
    %c0_30 = arith.constant 0 : index
    %37 = vector.load %arg9[%c1_29, %c0_30] : memref<36x128xbf16, #tpu.memory_space<vmem>>, vector<34x128xbf16>
    %c1_31 = arith.constant 1 : index
    %c0_32 = arith.constant 0 : index
    %c0_33 = arith.constant 0 : index
    %38 = vector.load %arg2[%c1_31, %c0_32, %c0_33] : memref<3x128x128xbf16, #tpu.memory_space<vmem>>, vector<1x128x128xbf16>
    %39 = vector.shape_cast %38 : vector<1x128x128xbf16> to vector<128x128xbf16>
    %cst_34 = arith.constant dense<0.000000e+00> : vector<34x128xf32>
    %40 = tpu.matmul %37, %39, %cst_34 {dimension_numbers = #tpu.dot_dimension_numbers<[1], [0], [0], [1], [0, 0, 1, 1], [], []>} : vector<34x128xbf16>, vector<128x128xbf16>, vector<34x128xf32> -> vector<34x128xf32>
    %41 = arith.addf %36, %40 : vector<34x128xf32>
    %c2 = arith.constant 2 : index
    %c0_35 = arith.constant 0 : index
    %42 = vector.load %arg9[%c2, %c0_35] : memref<36x128xbf16, #tpu.memory_space<vmem>>, vector<34x128xbf16>
    %c2_36 = arith.constant 2 : index
    %c0_37 = arith.constant 0 : index
    %c0_38 = arith.constant 0 : index
    %43 = vector.load %arg2[%c2_36, %c0_37, %c0_38] : memref<3x128x128xbf16, #tpu.memory_space<vmem>>, vector<1x128x128xbf16>
    %44 = vector.shape_cast %43 : vector<1x128x128xbf16> to vector<128x128xbf16>
    %cst_39 = arith.constant dense<0.000000e+00> : vector<34x128xf32>
    %45 = tpu.matmul %42, %44, %cst_39 {dimension_numbers = #tpu.dot_dimension_numbers<[1], [0], [0], [1], [0, 0, 1, 1], [], []>} : vector<34x128xbf16>, vector<128x128xbf16>, vector<34x128xf32> -> vector<34x128xf32>
    %46 = arith.addf %41, %45 : vector<34x128xf32>
    %c0_40 = arith.constant 0 : index
    %c0_41 = arith.constant 0 : index
    %47 = vector.load %arg3[%c0_40, %c0_41] : memref<1x128xf32, #tpu.memory_space<vmem>>, vector<1x128xf32>
    %48 = vector.broadcast %47 : vector<1x128xf32> to vector<34x128xf32>
    %49 = arith.addf %46, %48 : vector<34x128xf32>
    %cst_42 = arith.constant 0.000000e+00 : f32
    %50 = vector.broadcast %cst_42 : f32 to vector<1x128xf32>
    %cst_43 = arith.constant 0.000000e+00 : f32
    %51 = vector.broadcast %cst_43 : f32 to vector<1x128xf32>
    %52 = vector.extract_strided_slice %49 {offsets = [0, 0], sizes = [16, 128], strides = [1, 1]} : vector<34x128xf32> to vector<16x128xf32>
    %53 = arith.truncf %52 : vector<16x128xf32> to vector<16x128xbf16>
    %c0_44 = arith.constant 0 : index
    %c0_45 = arith.constant 0 : index
    %c0_46 = arith.constant 0 : index
    %54 = vector.load %arg6[%c0_44, %c0_45, %c0_46] : memref<2x16x128xbf16, #tpu.memory_space<vmem>>, vector<1x16x128xbf16>
    %55 = vector.shape_cast %54 : vector<1x16x128xbf16> to vector<16x128xbf16>
    %56 = vector.shape_cast %53 : vector<16x128xbf16> to vector<1x16x128xbf16>
    tpu.vector_store %arg6[%c0_44, %c0_45, %c0_46], %56 {strides = array<i32>} : memref<2x16x128xbf16, #tpu.memory_space<vmem>>, vector<1x16x128xbf16>,
    %57 = arith.extf %53 : vector<16x128xbf16> to vector<16x128xf32>
    %cst_47 = arith.constant dense<0.000000e+00> : vector<128xf32>
    %58 = vector.multi_reduction <add>, %57, %cst_47 [0] : vector<16x128xf32> to vector<128xf32>
    %59 = vector.shape_cast %58 : vector<128xf32> to vector<1x128xf32>
    %60 = arith.addf %50, %59 : vector<1x128xf32>
    %61 = arith.mulf %57, %57 : vector<16x128xf32>
    %cst_48 = arith.constant dense<0.000000e+00> : vector<128xf32>
    %62 = vector.multi_reduction <add>, %61, %cst_48 [0] : vector<16x128xf32> to vector<128xf32>
    %63 = vector.shape_cast %62 : vector<128xf32> to vector<1x128xf32>
    %64 = arith.addf %51, %63 : vector<1x128xf32>
    %65 = vector.extract_strided_slice %49 {offsets = [18, 0], sizes = [16, 128], strides = [1, 1]} : vector<34x128xf32> to vector<16x128xf32>
    %66 = arith.truncf %65 : vector<16x128xf32> to vector<16x128xbf16>
    %c1_49 = arith.constant 1 : index
    %c0_50 = arith.constant 0 : index
    %c0_51 = arith.constant 0 : index
    %67 = vector.load %arg6[%c1_49, %c0_50, %c0_51] : memref<2x16x128xbf16, #tpu.memory_space<vmem>>, vector<1x16x128xbf16>
    %68 = vector.shape_cast %67 : vector<1x16x128xbf16> to vector<16x128xbf16>
    %69 = vector.shape_cast %66 : vector<16x128xbf16> to vector<1x16x128xbf16>
    tpu.vector_store %arg6[%c1_49, %c0_50, %c0_51], %69 {strides = array<i32>} : memref<2x16x128xbf16, #tpu.memory_space<vmem>>, vector<1x16x128xbf16>,
    %70 = arith.extf %66 : vector<16x128xbf16> to vector<16x128xf32>
    %cst_52 = arith.constant dense<0.000000e+00> : vector<128xf32>
    %71 = vector.multi_reduction <add>, %70, %cst_52 [0] : vector<16x128xf32> to vector<128xf32>
    %72 = vector.shape_cast %71 : vector<128xf32> to vector<1x128xf32>
    %73 = arith.addf %60, %72 : vector<1x128xf32>
    %74 = arith.mulf %70, %70 : vector<16x128xf32>
    %cst_53 = arith.constant dense<0.000000e+00> : vector<128xf32>
    %75 = vector.multi_reduction <add>, %74, %cst_53 [0] : vector<16x128xf32> to vector<128xf32>
    %76 = vector.shape_cast %75 : vector<128xf32> to vector<1x128xf32>
    %77 = arith.addf %64, %76 : vector<1x128xf32>
    %c0_54 = arith.constant 0 : index
    %c0_55 = arith.constant 0 : index
    %78 = vector.load %arg7[%c0_54, %c0_55] : memref<1x128xf32, #tpu.memory_space<vmem>>, vector<1x128xf32>
    tpu.vector_store %arg7[%c0_54, %c0_55], %73 {strides = array<i32>} : memref<1x128xf32, #tpu.memory_space<vmem>>, vector<1x128xf32>,
    %c0_56 = arith.constant 0 : index
    %c0_57 = arith.constant 0 : index
    %79 = vector.load %arg8[%c0_56, %c0_57] : memref<1x128xf32, #tpu.memory_space<vmem>>, vector<1x128xf32>
    tpu.vector_store %arg8[%c0_56, %c0_57], %77 {strides = array<i32>} : memref<1x128xf32, #tpu.memory_space<vmem>>, vector<1x128xf32>,
    return
  }
  func.func @transform_0(%arg0: i32) -> (i32, i32, i32) {
    %c0_i32 = arith.constant 0 : i32
    %c0_i32_0 = arith.constant 0 : i32
    %c0_i32_1 = arith.constant 0 : i32
    %c0_i32_2 = arith.constant 0 : i32
    return %c0_i32, %c0_i32_0, %c0_i32_1 : i32, i32, i32
  }
  func.func @transform_1(%arg0: i32) -> (i32, i32, i32) {
    %c0_i32 = arith.constant 0 : i32
    %c0_i32_0 = arith.constant 0 : i32
    %c0_i32_1 = arith.constant 0 : i32
    %c0_i32_2 = arith.constant 0 : i32
    return %c0_i32, %c0_i32_0, %c0_i32_1 : i32, i32, i32
  }
  func.func @transform_2(%arg0: i32) -> (i32, i32) {
    %c0_i32 = arith.constant 0 : i32
    %c0_i32_0 = arith.constant 0 : i32
    %c0_i32_1 = arith.constant 0 : i32
    return %c0_i32, %c0_i32_0 : i32, i32
  }
  func.func @transform_3(%arg0: i32) -> (i32, i32) {
    %c0_i32 = arith.constant 0 : i32
    %c0_i32_0 = arith.constant 0 : i32
    %c0_i32_1 = arith.constant 0 : i32
    return %c0_i32, %c0_i32_0 : i32, i32
  }
  func.func @transform_4(%arg0: i32) -> (i32, i32) {
    %c0_i32 = arith.constant 0 : i32
    %c0_i32_0 = arith.constant 0 : i32
    %c0_i32_1 = arith.constant 0 : i32
    return %c0_i32, %c0_i32_0 : i32, i32
  }
  func.func @transform_5(%arg0: i32) -> (i32, i32, i32) {
    %c0_i32 = arith.constant 0 : i32
    %c0_i32_0 = arith.constant 0 : i32
    %c0_i32_1 = arith.constant 0 : i32
    %c0_i32_2 = arith.constant 0 : i32
    return %c0_i32, %c0_i32_0, %c0_i32_1 : i32, i32, i32
  }
  func.func @transform_6(%arg0: i32) -> (i32, i32) {
    %c0_i32 = arith.constant 0 : i32
    %c0_i32_0 = arith.constant 0 : i32
    %c0_i32_1 = arith.constant 0 : i32
    return %c0_i32, %c0_i32_0 : i32, i32
  }
  func.func @transform_7(%arg0: i32) -> (i32, i32) {
    %c0_i32 = arith.constant 0 : i32
    %c0_i32_0 = arith.constant 0 : i32
    %c0_i32_1 = arith.constant 0 : i32
    return %c0_i32, %c0_i32_0 : i32, i32
  }
}

module attributes {stable_mosaic.version = 11 : i64} {
  func.func @bn_relu_kernel(%arg0: i32, %arg1: memref<1x16x128xbf16, #tpu.memory_space<vmem>>, %arg2: memref<1x128xf32, #tpu.memory_space<vmem>>, %arg3: memref<1x128xf32, #tpu.memory_space<vmem>>, %arg4: memref<1x16x128xbf16, #tpu.memory_space<vmem>>) attributes {dimension_semantics = [#tpu.dimension_semantics<parallel>], iteration_bounds = array<i64: 2>, scalar_prefetch = 0 : i64, scratch_operands = 0 : i64, tpu.core_type = #tpu.core_type<tc>, window_params = [{transform_indices = @transform_0, window_bounds = array<i64: 1, 16, 128>}, {pipeline_mode = #tpu.pipeline_mode<synchronous>, transform_indices = @transform_1, window_bounds = array<i64: 1, 128>}, {pipeline_mode = #tpu.pipeline_mode<synchronous>, transform_indices = @transform_2, window_bounds = array<i64: 1, 128>}, {transform_indices = @transform_3, window_bounds = array<i64: 1, 16, 128>}]} {
    %c0 = arith.constant 0 : index
    %c0_0 = arith.constant 0 : index
    %c0_1 = arith.constant 0 : index
    %0 = vector.load %arg1[%c0, %c0_0, %c0_1] : memref<1x16x128xbf16, #tpu.memory_space<vmem>>, vector<1x16x128xbf16>
    %1 = arith.extf %0 : vector<1x16x128xbf16> to vector<1x16x128xf32>
    %c0_2 = arith.constant 0 : index
    %c0_3 = arith.constant 0 : index
    %2 = vector.load %arg2[%c0_2, %c0_3] : memref<1x128xf32, #tpu.memory_space<vmem>>, vector<1x128xf32>
    %3 = vector.shape_cast %2 : vector<1x128xf32> to vector<1x1x128xf32>
    %c0_4 = arith.constant 0 : index
    %c0_5 = arith.constant 0 : index
    %4 = vector.load %arg3[%c0_4, %c0_5] : memref<1x128xf32, #tpu.memory_space<vmem>>, vector<1x128xf32>
    %5 = vector.shape_cast %4 : vector<1x128xf32> to vector<1x1x128xf32>
    %6 = vector.broadcast %3 : vector<1x1x128xf32> to vector<1x16x128xf32>
    %7 = arith.mulf %1, %6 : vector<1x16x128xf32>
    %8 = vector.broadcast %5 : vector<1x1x128xf32> to vector<1x16x128xf32>
    %9 = arith.addf %7, %8 : vector<1x16x128xf32>
    %cst = arith.constant 0.000000e+00 : f32
    %10 = vector.broadcast %cst : f32 to vector<1x16x128xf32>
    %11 = arith.maximumf %9, %10 : vector<1x16x128xf32>
    %12 = arith.truncf %11 : vector<1x16x128xf32> to vector<1x16x128xbf16>
    %c0_6 = arith.constant 0 : index
    %c0_7 = arith.constant 0 : index
    %c0_8 = arith.constant 0 : index
    %13 = vector.load %arg4[%c0_6, %c0_7, %c0_8] : memref<1x16x128xbf16, #tpu.memory_space<vmem>>, vector<1x16x128xbf16>
    tpu.vector_store %arg4[%c0_6, %c0_7, %c0_8], %12 {strides = array<i32>} : memref<1x16x128xbf16, #tpu.memory_space<vmem>>, vector<1x16x128xbf16>,
    return
  }
  func.func @transform_0(%arg0: i32) -> (i32, i32, i32) {
    %c0_i32 = arith.constant 0 : i32
    %c0_i32_0 = arith.constant 0 : i32
    %c0_i32_1 = arith.constant 0 : i32
    return %arg0, %c0_i32, %c0_i32_0 : i32, i32, i32
  }
  func.func @transform_1(%arg0: i32) -> (i32, i32) {
    %c0_i32 = arith.constant 0 : i32
    %c0_i32_0 = arith.constant 0 : i32
    %c0_i32_1 = arith.constant 0 : i32
    return %c0_i32, %c0_i32_0 : i32, i32
  }
  func.func @transform_2(%arg0: i32) -> (i32, i32) {
    %c0_i32 = arith.constant 0 : i32
    %c0_i32_0 = arith.constant 0 : i32
    %c0_i32_1 = arith.constant 0 : i32
    return %c0_i32, %c0_i32_0 : i32, i32
  }
  func.func @transform_3(%arg0: i32) -> (i32, i32, i32) {
    %c0_i32 = arith.constant 0 : i32
    %c0_i32_0 = arith.constant 0 : i32
    %c0_i32_1 = arith.constant 0 : i32
    return %arg0, %c0_i32, %c0_i32_0 : i32, i32, i32
  }
}

</mosaic_0001>

<bundles_post_ra>
// kernel: tile.33
= control target key start
LH: loop header
LB: loop body
LE: loop exit
PB: predicated region body
PF: predicated region fallthrough
CT: control target
= control target key end

     0   :  { %s28_s0 = inlined_call_operand.vmem [shape: f32[8], index: 0, kind: input, shape index: {}]   ;;  %s29_s1 = inlined_call_operand.vmem [shape: f32[16,8], index: 1, kind: output, shape index: {}]  }
   0x1   :  { %v4_v0 = vld [vmem:[%s28_s0] ss:$0 sm:$0xff] }
   0x2   :  { %5 = vst [vmem:[%s29_s1] sm:$0xff] %v4_v0  ;;  %8 = vst [vmem:[%s29_s1 + $0x8] sm:$0xff] %v4_v0 }

// kernel: tile.34
= control target key start
LH: loop header
LB: loop body
LE: loop exit
PB: predicated region body
PF: predicated region fallthrough
CT: control target
= control target key end

     0   :  { %s131_s10 = smov 120   ;;  %s132_s11 = smov 104   ;;  %vm3_vm0 = vcmask 64512   ;;  %vm9_vm1 = vcmask 1048512   ;;  %vm15_vm2 = vcmask 982912   ;;  %vm21_vm3 = vcmask 917312   ;;  %s207_s0 = inlined_call_operand.vmem [shape: f32[16,8], index: 0, kind: input, shape index: {}]   ;;  %s208_s1 = inlined_call_operand.vmem [shape: f32[1,128], index: 1, kind: output, shape index: {}]  }
   0x1   :  { %v101_v0 = vld [vmem:[%s207_s0 + $0xf] sm:$0x1]   ;;  %v103_v1 = vld [vmem:[%s207_s0 + $0xd] sm:$0x1]   ;;  %v102_v2 = vld [vmem:[%s207_s0 + $0xe] sm:$0x1]  }
   0x2   :  { %7 = vrot.lane.b32.xlu0 %v101_v0, %s131_s10  ;;  %19 = vrot.lane.b32.xlu1 %v103_v1, %s132_s11  ;;  %v104_v3 = vld [vmem:[%s207_s0 + $0xc] sm:$0x1]   ;;  %s133_s16 = smov 112   ;;  %s134_s17 = smov 96   ;;  %v105_v4 = vld [vmem:[%s207_s0 + $0xb] sm:$0x1]  }
   0x3   :  { %v106_v5 = vld [vmem:[%s207_s0 + $0xa] sm:$0x1]   ;;  %v2_v6 = vld [vmem:[%s207_s0] sm:$0x1]   ;;  %s135_s24 = smov 88   ;;  %s136_s25 = smov 80  }
   0x4   :  { %4 = vst.msk [vmem:[#allocation0] sm:$0x1] %vm3_vm0, %v2_v6   ;;  %v107_v7 = vld [vmem:[%s207_s0 + $0x9] sm:$0x1]   ;;  %v108_v8 = vld [vmem:[%s207_s0 + $0x8] sm:$0x1]  }
   0x5   :  { %s137_s30 = smov 72   ;;  %s138_s2 = smov 64   ;;  %v109_v9 = vld [vmem:[%s207_s0 + $0x7] sm:$0x1]   ;;  %v110_v10 = vld [vmem:[%s207_s0 + $0x6] sm:$0x1]  }
   0x6   :  { %13 = vrot.lane.b32.xlu0 %v102_v2, %s133_s16  ;;  %25 = vrot.lane.b32.xlu1 %v104_v3, %s134_s17  ;;  %s139_s7 = smov 56   ;;  %s140_s8 = smov 48   ;;  %v111_v11 = vld [vmem:[%s207_s0 + $0x5] sm:$0x1]   ;;  %v112_v12 = vld [vmem:[%s207_s0 + $0x4] sm:$0x1]  }
   0x7   :  { %s141_s13 = smov 40   ;;  %s142_s14 = smov 32   ;;  %v113_v13 = vld [vmem:[%s207_s0 + $0x3] sm:$0x1]   ;;  %v114_v14 = vld [vmem:[%s207_s0 + $0x2] sm:$0x1]  }
   0x8   :  { %s143_s19 = smov 24   ;;  %s144_s20 = smov 16   ;;  %v115_v15 = vld [vmem:[%s207_s0 + $0x1] sm:$0x1]   ;;  %vm27_vm4 = vcmask 851712   ;;  %vm33_vm5 = vcmask 786112  }
   0x9   :  { %s145_s0 = smov 8   ;;  %vm39_vm6 = vcmask 720512   ;;  %vm45_vm7 = vcmask 654912   ;;  %vm51_vm8 = vcmask 589312   ;;  %vm57_vm9 = vcmask 523712  }
   0xa   :  { %31 = vrot.lane.b32.xlu0 %v105_v4, %s135_s24  ;;  %37 = vrot.lane.b32.xlu1 %v106_v5, %s136_s25  ;;  %vm63_vm10 = vcmask 458112   ;;  %vm69_vm11 = vcmask 392512   ;;  %vm75_vm12 = vcmask 326912   ;;  %vm81_vm13 = vcmask 261312  }
   0xb   :  { %vm87_vm14 = vcmask 195712   ;;  %vm93_vm15 = vcmask 130112  }
   0xe   :  { %43 = vrot.lane.b32.xlu0 %v107_v7, %s137_s30  ;;  %49 = vrot.lane.b32.xlu1 %v108_v8, %s138_s2 }
  0x12   :  { %55 = vrot.lane.b32.xlu0 %v109_v9, %s139_s7  ;;  %61 = vrot.lane.b32.xlu1 %v110_v10, %s140_s8 }
  0x16   :  { %67 = vrot.lane.b32.xlu0 %v111_v11, %s141_s13  ;;  %73 = vrot.lane.b32.xlu1 %v112_v12, %s142_s14 }
  0x1a   :  { %79 = vrot.lane.b32.xlu0 %v113_v13, %s143_s19  ;;  %85 = vrot.lane.b32.xlu1 %v114_v14, %s144_s20 }
  0x1e   :  { %91 = vrot.lane.b32.xlu0 %v115_v15, %s145_s0 }
  0x74   :  { %v8_v16 = vpop.permute.xlu0 %7   ;;  %v20_v17 = vpop.permute.xlu1 %19  }
  0x75   :  { %10 = vst.msk [vmem:[#allocation0] sm:$0x1] %vm9_vm1, %v8_v16  }
  0x78   :  { %v14_v18 = vpop.permute.xlu0 %13   ;;  %v26_v19 = vpop.permute.xlu1 %25  }
  0x79   :  { %16 = vst.msk [vmem:[#allocation0] sm:$0x1] %vm15_vm2, %v14_v18  }
  0x7a   :  { %22 = vst.msk [vmem:[#allocation0] sm:$0x1] %vm21_vm3, %v20_v17  }
  0x7b   :  { %28 = vst.msk [vmem:[#allocation0] sm:$0x1] %vm27_vm4, %v26_v19  }
  0x7c   :  { %v32_v20 = vpop.permute.xlu0 %31   ;;  %v38_v21 = vpop.permute.xlu1 %37  }
  0x7d   :  { %34 = vst.msk [vmem:[#allocation0] sm:$0x1] %vm33_vm5, %v32_v20  }
  0x7e   :  { %40 = vst.msk [vmem:[#allocation0] sm:$0x1] %vm39_vm6, %v38_v21  }
  0x80   :  { %v44_v22 = vpop.permute.xlu0 %43   ;;  %v50_v23 = vpop.permute.xlu1 %49  }
  0x81   :  { %46 = vst.msk [vmem:[#allocation0] sm:$0x1] %vm45_vm7, %v44_v22  }
  0x82   :  { %52 = vst.msk [vmem:[#allocation0] sm:$0x1] %vm51_vm8, %v50_v23  }
  0x84   :  { %v56_v24 = vpop.permute.xlu0 %55   ;;  %v62_v25 = vpop.permute.xlu1 %61  }
  0x85   :  { %58 = vst.msk [vmem:[#allocation0] sm:$0x1] %vm57_vm9, %v56_v24  }
  0x86   :  { %64 = vst.msk [vmem:[#allocation0] sm:$0x1] %vm63_vm10, %v62_v25  }
  0x88   :  { %v68_v26 = vpop.permute.xlu0 %67   ;;  %v74_v27 = vpop.permute.xlu1 %73  }
  0x89   :  { %70 = vst.msk [vmem:[#allocation0] sm:$0x1] %vm69_vm11, %v68_v26  }
  0x8a   :  { %76 = vst.msk [vmem:[#allocation0] sm:$0x1] %vm75_vm12, %v74_v27  }
  0x8c   :  { %v80_v28 = vpop.permute.xlu0 %79   ;;  %v86_v29 = vpop.permute.xlu1 %85  }
  0x8d   :  { %82 = vst.msk [vmem:[#allocation0] sm:$0x1] %vm81_vm13, %v80_v28  }
  0x8e   :  { %88 = vst.msk [vmem:[#allocation0] sm:$0x1] %vm87_vm14, %v86_v29  }
  0x90   :  { %v92_v30 = vpop.permute.xlu0 %91  }
  0x91   :  { %94 = vst.msk [vmem:[#allocation0] sm:$0x1] %vm93_vm15, %v92_v30  }
  0x98   :  { %v98_v31 = vld [vmem:[#allocation0] sm:$0x1] }
  0x99   :  { %100 = vst [vmem:[%s208_s1] sm:$0x1] %v98_v31 }

// kernel: vgg_block_forward.3
= control target key start
LH: loop header
LB: loop body
LE: loop exit
PB: predicated region body
PF: predicated region fallthrough
CT: control target
= control target key end

     0   :  { %v760_v0 = vmov 0.0   ;;  %vm63_vm0 = vcmask 517121   ;;  %vm761_vm1 = vmmov 0   ;;  %vm64_vm2 = vsmask.f32 1280  ;;  %s985_s1 = inlined_call_operand.vmem [shape: bf16[3,64,128], index: 1, kind: input, shape index: {}]   ;;  %s986_s0 = inlined_call_operand.vmem [shape: bf16[2,16,64], index: 0, kind: input, shape index: {}]   ;;  %s987_s2 = inlined_call_operand.vmem [shape: f32[1,128], index: 2, kind: input, shape index: {}]   ;;  %s988_s3 = inlined_call_operand.vmem [shape: bf16[2,16,128], index: 3, kind: output, shape index: {0}]   ;;  %s989_s4 = inlined_call_operand.vmem [shape: f32[1,128], index: 4, kind: output, shape index: {1}]   ;;  %s990_s5 = inlined_call_operand.vmem [shape: f32[1,128], index: 5, kind: output, shape index: {2}]  }
   0x1   :  { %733 = vmatprep.subr.bf16.mxu1 %v760_v0  ;;  %673 = vmatprep.subr.bf16.mxu0 %v760_v0  ;;  %v743_v1 = vld [vmem:[%s985_s1 + $0x20] sm:$0xff]   ;;  %v744_v2 = vld [vmem:[%s985_s1 + $0x28] sm:$0xff]   ;;  %vm101_vm3 = vcmask 519169   ;;  %vm107_vm4 = vcmask 517120   ;;  %vm18_vm5 = vcmask 516096   ;;  %v745_v7 = vld [vmem:[%s985_s1 + $0x30] sm:$0xff]  }
   0x2   :  { %689 = vmatprep.mubr.msk.bf16.mxu1 %vm761_vm1, %v760_v0  ;;  %681 = vmatprep.mubr.msk.bf16.mxu0 %vm761_vm1, %v760_v0  ;;  %vm69_vm6 = vsmask.f32 7942  ;;  %v71_v3 = vld [vmem:[#allocation2 + $0x10] sm:$0x2]  ;;  %v590_v4 = vld [vmem:[%s986_s0 + $0xc] sm:$0xf]  ;;  %vm818_vm9 = vmand %vm63_vm0, %vm64_vm2 }
   0x3   :  { %737 = vmatpush3.bf16.msra.mxu1 %v743_v1  ;;  %674 = vmatpush3.bf16.msra.mxu0 %v743_v1  ;;  %vm70_vm7 = vmand %vm63_vm0, %vm69_vm6  ;;  %v89_v5 = vshrl.u32 %v590_v4, 16  ;;  %v92_v6 = vshll.u32 %v590_v4, 16  ;;  %vm19_vm8 = vsmask.f32 256  ;;  %v21_v9 = vld [vmem:[#allocation2] sm:$0x1] }
   0x4   :  { %734 = vmatprep.subr.bf16.mxu1 %v760_v0  ;;  %675 = vmatprep.subr.bf16.mxu0 %v760_v0  ;;  %v72_v8 = vsel %vm70_vm7, 0, %v71_v3  ;;  %vm24_vm10 = vsmask.f32 7938  ;;  %v26_v13 = vld [vmem:[#allocation2 + $0x8] sm:$0x1]  ;;  %vm824_vm11 = vmand %vm18_vm5, %vm19_vm8  ;;  %v746_v17 = vld [vmem:[%s985_s1 + $0x38] sm:$0xff]  }
   0x5   :  { %73 = vst [vmem:[#allocation2 + $0x10] sm:$0x2] %v72_v8  ;;  %v91_v11 = vrot.slane %v89_v5, 6  ;;  %v94_v12 = vrot.slane %v92_v6, 7  ;;  %v29_v15 = vld [vmem:[%s986_s0] sm:$0xf]  ;;  %vm841_vm13 = vmand %vm18_vm5, %vm24_vm10 }
   0x6   :  { %v30_v16 = vld [vmem:[%s986_s0 + $0x4] sm:$0xf]  ;;  %vm31_vm12 = vsmask.f32 4368  ;;  %v22_v19 = vsel %vm824_vm11, 0, %v21_v9  ;;  %v34_v21 = vshrl.u32 %v29_v15, 16  ;;  %vm847_vm14 = vmand %vm101_vm3, %vm69_vm6 }
   0x7   :  { %738 = vmatpush3.bf16.msra.mxu1 %v744_v2  ;;  %676 = vmatpush3.bf16.msra.mxu0 %v744_v2  ;;  %v95_v18 = vor.u32 %v94_v12, %v91_v11  ;;  %v37_v22 = vshll.u32 %v29_v15, 16  ;;  %v66_v23 = vld [vmem:[#allocation2 + $0x8] sm:$0x2]  ;;  %23 = vst [vmem:[#allocation2] sm:$0x1] %v22_v19  ;;  %v27_v25 = vsel %vm841_vm13, 0, %v26_v13  ;;  %vm860_vm0 = vmand %vm107_vm4, %vm64_vm2 }
   0x8   :  { %735 = vmatprep.subr.bf16.mxu1 %v760_v0  ;;  %677 = vmatprep.subr.bf16.mxu0 %v760_v0  ;;  %v42_v26 = vshrl.u32 %v30_v16, 16  ;;  %v45_v27 = vshll.u32 %v30_v16, 16  ;;  %vm53_vm15 = vcmask 519168   ;;  %v589_v28 = vld [vmem:[%s986_s0 + $0x8] sm:$0xf]  ;;  %v36_v31 = vrot.slane %v34_v21, 7  ;;  %vm868_vm5 = vmor %vm19_vm8, %vm31_vm12 }
   0x9   :  { %v97_v29 = vrot.slane %v95_v18, 4  ;;  %28 = vst [vmem:[#allocation2 + $0x8] sm:$0x1] %v27_v25  ;;  %v67_v32 = vsel %vm818_vm9, 0, %v66_v23  ;;  %vm77_vm3 = vsmask.f32 5392  ;;  %vm874_vm4 = vmand %vm53_vm15, %vm24_vm10 }
   0xa   :  { %v44_v34 = vrot.slane %v42_v26, 7  ;;  %68 = vst [vmem:[#allocation2 + $0x8] sm:$0x2] %v67_v32  ;;  %v80_v35 = vshrl.u32 %v589_v28, 16  ;;  %v83_v36 = vshll.u32 %v589_v28, 16  ;;  %v39_v37 = vor.u32 %v37_v22, %v36_v31  ;;  %vm879_vm6 = vmor %vm64_vm2, %vm77_vm3  ;;  %v748_v63 = vld [vmem:[%s985_s1] sm:$0xff]  }
   0xb   :  { %739 = vmatpush3.bf16.msra.mxu1 %v745_v7  ;;  %678 = vmatpush3.bf16.msra.mxu0 %v745_v7  ;;  %v40_v38 = vrot.slane %v36_v31, 4  ;;  %vm196_vm2 = vcmask 523264   ;;  %vm148_vm7 = vsmask.f32 7424  ;;  %v752_v9 = vld [vmem:[%s985_s1 + $0x8] sm:$0xff]   ;;  %v751_v11 = vld [vmem:[%s985_s1 + $0x40] sm:$0xff]  }
   0xc   :  { %736 = vmatprep.subr.bf16.mxu1 %v760_v0  ;;  %679 = vmatprep.subr.bf16.mxu0 %v760_v0  ;;  %v109_v40 = vld [vmem:[#allocation2 + $0x10] sm:$0x3]  ;;  %v47_v41 = vor.u32 %v45_v27, %v44_v34  ;;  %v49_v42 = vrot.slane %v44_v34, 4  ;;  %v82_v44 = vrot.slane %v80_v35, 6  ;;  %v85_v45 = vrot.slane %v83_v36, 7  ;;  %v753_v15 = vld [vmem:[%s985_s1 + $0x48] sm:$0xff]  }
   0xd   :  { %v110_v46 = vsel %vm860_vm0, %v97_v29, %v109_v40  ;;  %v754_v14 = vld [vmem:[%s985_s1 + $0x10] sm:$0xff]   ;;  %v757_v22 = vld [vmem:[%s985_s1 + $0x58] sm:$0xff]   ;;  %vm365_vm8 = vcmask 1046528   ;;  %vm518_vm9 = vcmask 1046532  }
   0xe   :  { %111 = vst [vmem:[#allocation2 + $0x10] sm:$0x3] %v110_v46  ;;  %v48_v47 = vsel %vm868_vm5, %v40_v38, %v47_v41  ;;  %v86_v48 = vor.u32 %v85_v45, %v82_v44  ;;  %v55_v49 = vld [vmem:[#allocation2] sm:$0xf]  ;;  %v755_v20 = vld [vmem:[%s985_s1 + $0x50] sm:$0xff]  }
   0xf   :  { %740 = vmatpush3.bf16.msra.mxu1 %v746_v17  ;;  %680 = vmatpush3.bf16.msra.mxu0 %v746_v17  ;;  %59 = vst.msk [vmem:[#allocation2 + $0x4] sm:$0xf] %vm53_vm15, %v48_v47  ;;  %v56_v50 = vsel %vm874_vm4, %v39_v37, %v55_v49  ;;  %v633_v49 = vld [vmem:[%s987_s2] ss:$0 sm:$0xff] }
  0x10   :  { %693 = vmatprep.subr.bf16.mxu1 %v760_v0  ;;  %713 = vmatprep.subr.bf16.mxu0 %v760_v0  ;;  %v60_v51 = vld [vmem:[#allocation2 + $0x8] sm:$0x1]  ;;  %v87_v52 = vrot.slane %v86_v48, 4  ;;  %57 = vst [vmem:[#allocation2] sm:$0xf] %v56_v50 }
  0x11   :  { %v61_v53 = vsel %vm824_vm11, %v49_v42, %v60_v51  ;;  %v103_v54 = vld [vmem:[#allocation2 + $0x8] sm:$0xe]  ;;  %vm538_vm11 = vcmask 1045504  }
  0x12   :  { %62 = vst [vmem:[#allocation2 + $0x8] sm:$0x1] %v61_v53  ;;  %v96_v55 = vsel %vm879_vm6, %v87_v52, %v95_v18  ;;  %v104_v56 = vsel %vm847_vm14, %v86_v48, %v103_v54  ;;  %v756_v18 = vld [vmem:[%s985_s1 + $0x18] sm:$0xff]  }
  0x13   :  { %105 = vst [vmem:[#allocation2 + $0x8] sm:$0xe] %v104_v56  ;;  %106 = vst.msk [vmem:[#allocation2 + $0xc] sm:$0xf] %vm53_vm15, %v96_v55 }
  0x15   :  { %v899_v57 = vld [vmem:[#allocation2 + $0x10] ss:$0 sps:$4 sm:$0x33]  }
  0x16   :  { %v113_v58 = vld [vmem:[#allocation2 + $0x4] sm:$0xf]  ;;  %v165_v59 = vshll.u32 %v899_v57, 16  ;;  %v169_v60 = vshrl.u32 %v899_v57, 16  ;;  %v369_v26 = vrot.slane %v899_v57, 1 }
  0x17   :  { %v112_v61 = vld [vmem:[#allocation2] sm:$0xf]  ;;  %v759_v28 = vld [vmem:[#allocation2 + $0x10] ss:$0 sps:$4 sm:$0x11]  }
  0x18   :  { %v167_v62 = vrot.slane %v165_v59, 1  ;;  %v599_v1 = vcombine.low %v112_v61, %v113_v58  ;;  %v352_v17 = vld [vmem:[#allocation2] sm:$0xe] }
  0x19   :  { %v625_v21 = vcombine.low %v352_v17, %v113_v58 }
  0x1a   :  { %v750_v2 = vld [vmem:[#allocation2 + $0x8] sm:$0xff]   ;;  %v171_v3 = vor.u32 %v169_v60, %v167_v62  ;;  %v150_v4 = vshrl.u32 %v599_v1, 16  ;;  %v152_v5 = vshll.u32 %v599_v1, 16 }
  0x1b   :  { %v157_v6 = vshll.u32 %v750_v2, 16  ;;  %v161_v12 = vshrl.u32 %v750_v2, 16  ;;  %v366_v23 = vrot.slane %v625_v21, 1  ;;  %v367_v24 = vrot.slane %v750_v2, 1 }
  0x1c   :  { %690 = vmatmul.mubr.msk.bf16.vlgmr.msra.gmra.mrb[0].mxu1 %vm196_vm2, %v171_v3  ;;  %v154_v7 = vrot.slane %v152_v5, 1 }
  0x1d   :  { %694 = vmatpush3.bf16.msra.mxu1 %v748_v63  ;;  %v159_v8 = vrot.slane %v157_v6, 1  ;;  %701 = vmatprep.mubr.msk.bf16.mxu1 %vm761_vm1, %v760_v0  ;;  %v368_v25 = vsel %vm365_vm8, %v366_v23, %v367_v24  ;;  %v370_v27 = vsel %vm365_vm8, %v367_v24, %v369_v26 }
  0x1e   :  { %v155_v10 = vor.u32 %v154_v7, %v150_v4  ;;  %695 = vmatprep.subr.bf16.mxu1 %v760_v0 }
  0x1f   :  { %v163_v16 = vor.u32 %v161_v12, %v159_v8 }
  0x20   :  { %v160_v13 = vsel %vm148_vm7, %v155_v10, %v159_v8 }
  0x21   :  { %682 = vmatmul.mubr.msk.bf16.vlgmr.msra.gmra.mrb[0].mxu0 %vm196_vm2, %v160_v13  ;;  %696 = vmatpush3.bf16.msra.mxu1 %v752_v9  ;;  %v168_v19 = vsel %vm148_vm7, %v163_v16, %v167_v62 }
  0x22   :  { %714 = vmatpush3.bf16.msra.mxu0 %v751_v11  ;;  %697 = vmatprep.subr.bf16.mxu1 %v760_v0 }
  0x23   :  { %715 = vmatprep.subr.bf16.mxu0 %v760_v0  ;;  %685 = vmatprep.mubr.msk.bf16.mxu0 %vm761_vm1, %v760_v0 }
  0x25   :  { %698 = vmatpush3.bf16.msra.mxu1 %v754_v14 }
  0x26   :  { %716 = vmatpush3.bf16.msra.mxu0 %v753_v15  ;;  %699 = vmatprep.subr.bf16.mxu1 %v760_v0 }
  0x27   :  { %717 = vmatprep.subr.bf16.mxu0 %v760_v0 }
  0x29   :  { %686 = vmatmul.mubr.msk.bf16.gmra.mrb[4].mxu0 %vm196_vm2, %v168_v19  ;;  %700 = vmatpush3.bf16.msra.mxu1 %v756_v18 }
  0x2a   :  { %718 = vmatpush3.bf16.msra.mxu0 %v755_v20  ;;  %721 = vmatprep.mubr.msk.bf16.mxu0 %vm761_vm1, %v760_v0 }
  0x2b   :  { %719 = vmatprep.subr.bf16.mxu0 %v760_v0 }
  0x2c   :  { %702 = vmatmul.mubr.msk.bf16.vlgmr.msra.gmra.mrb[4].mxu1 %vm196_vm2, %v599_v1 }
  0x2d   :  { %705 = vmatprep.mubr.msk.bf16.mxu1 %vm761_vm1, %v760_v0 }
  0x2e   :  { %720 = vmatpush3.bf16.msra.mxu0 %v757_v22 }
  0x31   :  { %722 = vmatmul.mubr.msk.bf16.vlgmr.msra.gmra.mrb[8].mxu0 %vm196_vm2, %v368_v25 }
  0x32   :  { %725 = vmatprep.mubr.msk.bf16.mxu0 %vm761_vm1, %v760_v0 }
  0x34   :  { %706 = vmatmul.mubr.msk.bf16.gmra.mrb[8].mxu1 %vm196_vm2, %v750_v2 }
  0x35   :  { %709 = vmatprep.mubr.msk.bf16.mxu1 %vm761_vm1, %v760_v0 }
  0x39   :  { %726 = vmatmul.mubr.msk.bf16.gmra.mrb[12].mxu0 %vm196_vm2, %v370_v27 }
  0x3a   :  { %729 = vmatprep.mubr.msk.bf16.mxu0 %vm761_vm1, %v760_v0  ;;  %vm517_vm1 = vcmask 1042432  }
  0x3b   :  { %vm965_vm10 = vmor %vm517_vm1, %vm518_vm9 }
  0x3c   :  { %710 = vmatmul.mubr.msk.bf16.gmra.mrb[12].mxu1 %vm196_vm2, %v759_v28 }
  0x41   :  { %730 = vmatmul.mubr.msk.bf16.gmra.mrb[16].mxu0 %vm196_vm2, %v369_v26 }
  0xef   :  { %v256_v29 = vpop.f32.mrb[0].mxu1 }
  0xf0   :  { %v691_v30 = vpop.f32.mrb[1].mxu1 }
  0xf1   :  { %v259_v31 = vpop.f32.mrb[2].mxu1 }
  0xf2   :  { %v692_v32 = vpop.f32.mrb[3].mxu1 }
  0xf4   :  { %v240_v33 = vpop.f32.mrb[0].mxu0 }
  0xf5   :  { %v683_v34 = vpop.f32.mrb[1].mxu0 }
  0xf6   :  { %v243_v35 = vpop.f32.mrb[2].mxu0 }
  0xf7   :  { %v684_v36 = vpop.f32.mrb[3].mxu0 }
  0xfc   :  { %v248_v37 = vpop.f32.mrb[4].mxu0 }
  0xfd   :  { %v687_v38 = vpop.f32.mrb[5].mxu0 }
  0xfe   :  { %v251_v39 = vpop.f32.mrb[6].mxu0 }
  0xff   :  { %v688_v40 = vpop.f32.mrb[7].mxu0  ;;  %v330_v41 = vpop.f32.mrb[4].mxu1 }
 0x100   :  { %v331_v42 = vadd.f32 %v330_v41, %v240_v33  ;;  %v703_v43 = vpop.f32.mrb[5].mxu1 }
 0x101   :  { %v333_v0 = vpop.f32.mrb[6].mxu1 }
 0x102   :  { %v334_v44 = vadd.f32 %v333_v0, %v243_v35  ;;  %v704_v45 = vpop.f32.mrb[7].mxu1 }
 0x104   :  { %v438_v46 = vpop.f32.mrb[8].mxu0 }
 0x105   :  { %v460_v47 = vadd.f32 %v438_v46, %v331_v42  ;;  %v723_v48 = vpop.f32.mrb[9].mxu0 }
 0x106   :  { %v441_v50 = vpop.f32.mrb[10].mxu0 }
 0x107   :  { %v461_v51 = vadd.f32 %v441_v50, %v334_v44  ;;  %v724_v52 = vpop.f32.mrb[11].mxu0  ;;  %v338_v53 = vpop.f32.mrb[8].mxu1  ;;  %v472_v56 = vadd.f32 %v633_v49, %v460_v47 }
 0x108   :  { %v339_v54 = vadd.f32 %v338_v53, %v248_v37  ;;  %v707_v55 = vpop.f32.mrb[9].mxu1 }
 0x109   :  { %v473_v57 = vadd.f32 %v633_v49, %v461_v51  ;;  %v341_v58 = vpop.f32.mrb[10].mxu1 }
 0x10a   :  { %v342_v59 = vadd.f32 %v341_v58, %v251_v39  ;;  %v708_v60 = vpop.f32.mrb[11].mxu1 }
 0x10b   :  { %v477_v61 = vpack.c.bf16 %v473_v57, %v472_v56 }
 0x10c   :  { %v446_v62 = vpop.f32.mrb[12].mxu0 }
 0x10d   :  { %651 = vst [vmem:[%s988_s3] sm:$0xff] %v477_v61   ;;  %v462_v63 = vadd.f32 %v446_v62, %v339_v54  ;;  %v727_v1 = vpop.f32.mrb[13].mxu0  ;;  %v487_v3 = vunpack.c.l.bf16 %v477_v61  ;;  %v488_v4 = vunpack.c.h.bf16 %v477_v61 }
 0x10e   :  { %v449_v2 = vpop.f32.mrb[14].mxu0 }
 0x10f   :  { %v474_v5 = vadd.f32 %v633_v49, %v462_v63  ;;  %v728_v6 = vpop.f32.mrb[15].mxu0  ;;  %v346_v7 = vpop.f32.mrb[12].mxu1  ;;  %v463_v8 = vadd.f32 %v449_v2, %v342_v59  ;;  %v497_v15 = vmul.f32 %v487_v3, %v487_v3  ;;  %v498_v16 = vmul.f32 %v488_v4, %v488_v4 }
 0x110   :  { %v347_v9 = vadd.f32 %v346_v7, %v256_v29  ;;  %v711_v10 = vpop.f32.mrb[13].mxu1  ;;  %v489_v20 = vadd.f32 %v488_v4, %v487_v3 }
 0x111   :  { %v349_v11 = vpop.f32.mrb[14].mxu1  ;;  %v644_v12 = vpack.c.bf16 %v474_v5, %v474_v5  ;;  %v475_v13 = vadd.f32 %v633_v49, %v463_v8  ;;  %v499_v29 = vadd.f32 %v498_v16, %v497_v15 }
 0x112   :  { %v712_v14 = vpop.f32.mrb[15].mxu1  ;;  %v490_v33 = vrot.slane %v489_v20, 4 }
 0x113   :  { %v507_v17 = vpack.c.bf16 %v475_v13, %v474_v5  ;;  %v645_v18 = vpack.c.bf16 %v475_v13, %v475_v13  ;;  %v639_v24 = vrot.slane %v644_v12, 9  ;;  %v500_v37 = vrot.slane %v499_v29, 4 }
 0x114   :  { %v454_v19 = vpop.f32.mrb[16].mxu0  ;;  %v491_v43 = vadd.f32 %v490_v33, %v489_v20 }
 0x115   :  { %v464_v22 = vadd.f32 %v454_v19, %v347_v9  ;;  %v731_v23 = vpop.f32.mrb[17].mxu0  ;;  %v522_v25 = vrot.slane %v645_v18, 5  ;;  %v532_v26 = vunpack.c.l.bf16 %v507_v17  ;;  %v533_v27 = vunpack.c.h.bf16 %v507_v17 }
 0x116   :  { %v457_v28 = vpop.f32.mrb[18].mxu0  ;;  %v501_v48 = vadd.f32 %v500_v37, %v499_v29  ;;  %v492_v52 = vrot.slane %v491_v43, 2 }
 0x117   :  { %v476_v30 = vadd.f32 %v633_v49, %v464_v22  ;;  %v732_v31 = vpop.f32.mrb[19].mxu0  ;;  %v523_v32 = vsel %vm965_vm10, %v639_v24, %v522_v25  ;;  %v554_v34 = vmul.f32 %v532_v26, %v532_v26  ;;  %v555_v35 = vmul.f32 %v533_v27, %v533_v27 }
 0x118   :  { %640 = vst [vmem:[%s988_s3 + $0x8] sm:$0xf] %v523_v32  ;;  %v524_v38 = vrot.slane %v522_v25, 4  ;;  %v539_v39 = vrot.slane %v532_v26, 2  ;;  %v540_v40 = vrot.slane %v533_v27, 2  ;;  %v502_v56 = vrot.slane %v501_v48, 2 }
 0x119   :  { %v508_v36 = vpack.c.bf16 %v476_v30, %v476_v30  ;;  %v560_v0 = vrot.slane %v554_v34, 2  ;;  %v561_v44 = vrot.slane %v555_v35, 2  ;;  %v493_v59 = vadd.f32 %v492_v52, %v491_v43 }
 0x11a   :  { %v541_v49 = vsel %vm538_vm11, %v539_v39, %v540_v40  ;;  %v503_v62 = vadd.f32 %v502_v56, %v501_v48 }
 0x11b   :  { %v525_v41 = vrot.slane %v508_v36, 5  ;;  %v534_v42 = vunpack.c.l.bf16 %v508_v36  ;;  %v562_v54 = vsel %vm538_vm11, %v560_v0, %v561_v44  ;;  %v494_v2 = vrot.slane %v493_v59, 1 }
 0x11c   :  { %v504_v5 = vrot.slane %v503_v62, 1 }
 0x11d   :  { %v526_v45 = vsel %vm965_vm10, %v524_v38, %v525_v41  ;;  %v542_v46 = vrot.slane %v534_v42, 2  ;;  %v556_v47 = vmul.f32 %v534_v42, %v534_v42  ;;  %v495_v8 = vadd.f32 %v494_v2, %v493_v59 }
 0x11e   :  { %641 = vst [vmem:[%s988_s3 + $0xc] sm:$0xf] %v526_v45  ;;  %v505_v11 = vadd.f32 %v504_v5, %v503_v62 }
 0x11f   :  { %v543_v50 = vsel %vm538_vm11, %v540_v40, %v542_v46  ;;  %v563_v51 = vrot.slane %v556_v47, 2 }
 0x120   :  { %v546_v53 = vadd.f32 %v543_v50, %v541_v49 }
 0x121   :  { %v564_v55 = vsel %vm538_vm11, %v561_v44, %v563_v51 }
 0x122   :  { %v547_v57 = vrot.slane %v546_v53, 4  ;;  %v567_v58 = vadd.f32 %v564_v55, %v562_v54 }
 0x124   :  { %v548_v60 = vadd.f32 %v547_v57, %v546_v53  ;;  %v568_v61 = vrot.slane %v567_v58, 4 }
 0x126   :  { %v549_v63 = vrot.slane %v548_v60, 2  ;;  %v569_v1 = vadd.f32 %v568_v61, %v567_v58 }
 0x128   :  { %v550_v3 = vadd.f32 %v549_v63, %v548_v60  ;;  %v570_v4 = vrot.slane %v569_v1, 2 }
 0x12a   :  { %v551_v6 = vrot.slane %v550_v3, 1  ;;  %v571_v7 = vadd.f32 %v570_v4, %v569_v1 }
 0x12c   :  { %v552_v9 = vadd.f32 %v551_v6, %v550_v3  ;;  %v572_v10 = vrot.slane %v571_v7, 1 }
 0x12e   :  { %v553_v12 = vadd.f32 %v552_v9, %v495_v8  ;;  %v573_v13 = vadd.f32 %v572_v10, %v571_v7 }
 0x130   :  { %v574_v14 = vadd.f32 %v573_v13, %v505_v11  ;;  %575 = vst [vmem:[%s989_s4] sm:$0x1] %v553_v12 }
 0x132   :  { %576 = vst [vmem:[%s990_s5] sm:$0x1] %v574_v14 }

// kernel: vgg_block_forward.4
= control target key start
LH: loop header
LB: loop body
LE: loop exit
PB: predicated region body
PF: predicated region fallthrough
CT: control target
= control target key end

     0   :  { %v996_v0 = vmov 0.0   ;;  %vm997_vm0 = vmmov 0   ;;  %vm24_vm1 = vcmask 1040384   ;;  %vm25_vm2 = vsmask.f32 256  ;;  %s1263_s1 = inlined_call_operand.vmem [shape: bf16[3,128,128], index: 1, kind: input, shape index: {}]   ;;  %s1264_s0 = inlined_call_operand.vmem [shape: bf16[2,16,128], index: 0, kind: input, shape index: {}]   ;;  %s1265_s3 = inlined_call_operand.vmem [shape: f32[1,128], index: 3, kind: input, shape index: {}]   ;;  %s1266_s4 = inlined_call_operand.vmem [shape: f32[1,128], index: 4, kind: input, shape index: {}]   ;;  %s1267_s2 = inlined_call_operand.vmem [shape: f32[1,128], index: 2, kind: input, shape index: {}]   ;;  %s1268_s5 = inlined_call_operand.vmem [shape: bf16[2,16,128], index: 5, kind: output, shape index: {0}]   ;;  %s1269_s6 = inlined_call_operand.vmem [shape: f32[1,128], index: 6, kind: output, shape index: {1}]   ;;  %s1270_s7 = inlined_call_operand.vmem [shape: f32[1,128], index: 7, kind: output, shape index: {2}]  }
   0x1   :  { %865 = vmatprep.subr.bf16.mxu0 %v996_v0  ;;  %893 = vmatprep.subr.bf16.mxu1 %v996_v0  ;;  %v967_v1 = vld [vmem:[%s1263_s1 + $0x40] sm:$0xff]   ;;  %v969_v3 = vld [vmem:[%s1263_s1 + $0x48] sm:$0xff]   ;;  %v971_v5 = vld [vmem:[%s1263_s1 + $0x50] sm:$0xff]   ;;  %vm30_vm4 = vsmask.f32 7938  ;;  %vm96_vm6 = vcmask 1041409  }
   0x2   :  { %v968_v2 = vld [vmem:[%s1263_s1] sm:$0xff]   ;;  %909 = vmatprep.mubr.msk.bf16.mxu1 %vm997_vm0, %v996_v0  ;;  %881 = vmatprep.mubr.msk.bf16.mxu0 %vm997_vm0, %v996_v0  ;;  %v970_v4 = vld [vmem:[%s1263_s1 + $0x8] sm:$0xff]   ;;  %v972_v6 = vld [vmem:[%s1263_s1 + $0x10] sm:$0xff]   ;;  %vm97_vm7 = vsmask.f32 1280  ;;  %vm87_vm9 = vcmask 1043456  }
   0x3   :  { %866 = vmatpush3.bf16.msra.mxu0 %v967_v1  ;;  %894 = vmatpush3.bf16.msra.mxu1 %v968_v2  ;;  %v973_v7 = vld [vmem:[%s1263_s1 + $0x58] sm:$0xff]   ;;  %v975_v9 = vld [vmem:[%s1263_s1 + $0x60] sm:$0xff]   ;;  %vm1084_vm3 = vmand %vm24_vm1, %vm25_vm2  ;;  %vm162_vm10 = vcmask 1043457   ;;  %vm102_vm11 = vsmask.f32 7942  ;;  %vm168_vm14 = vcmask 1041408  }
   0x4   :  { %867 = vmatprep.subr.bf16.mxu0 %v996_v0  ;;  %895 = vmatprep.subr.bf16.mxu1 %v996_v0  ;;  %v974_v8 = vld [vmem:[%s1263_s1 + $0x18] sm:$0xff]   ;;  %v976_v10 = vld [vmem:[%s1263_s1 + $0x20] sm:$0xff]   ;;  %v32_v13 = vld [vmem:[#allocation2 + $0x8] sm:$0x1]  ;;  %vm65_vm13 = vsmask.f32 4368 }
   0x5   :  { %v27_v12 = vld [vmem:[#allocation2] sm:$0x1]  ;;  %vm31_vm5 = vmand %vm24_vm1, %vm30_vm4  ;;  %v977_v17 = vld [vmem:[%s1263_s1 + $0x68] sm:$0xff]   ;;  %vm138_vm15 = vsmask.f32 5392 }
   0x6   :  { %v28_v14 = vsel %vm1084_vm3, 0, %v27_v12  ;;  %v819_v15 = vld [vmem:[%s1264_s0] sm:$0xff]   ;;  %v33_v18 = vsel %vm31_vm5, 0, %v32_v13  ;;  %v831_v21 = vld [vmem:[%s1264_s0 + $0x8] sm:$0xff]   ;;  %vm98_vm8 = vmand %vm96_vm6, %vm97_vm7 }
   0x7   :  { %868 = vmatpush3.bf16.msra.mxu0 %v969_v3  ;;  %896 = vmatpush3.bf16.msra.mxu1 %v970_v4  ;;  %v729_v16 = vld [vmem:[%s1265_s3] ss:$0 sm:$0xff]  ;;  %29 = vst [vmem:[#allocation2] sm:$0x1] %v28_v14  ;;  %v820_v19 = vunpack.c.l.bf16 %v819_v15  ;;  %v821_v20 = vunpack.c.h.bf16 %v819_v15  ;;  %v978_v22 = vld [vmem:[%s1263_s1 + $0x28] sm:$0xff]   ;;  %v824_v24 = vunpack.c.l.bf16 %v831_v21  ;;  %v825_v25 = vunpack.c.h.bf16 %v831_v21  ;;  %v979_v32 = vld [vmem:[%s1263_s1 + $0x70] sm:$0xff]  }
   0x8   :  { %869 = vmatprep.subr.bf16.mxu0 %v996_v0  ;;  %897 = vmatprep.subr.bf16.mxu1 %v996_v0  ;;  %34 = vst [vmem:[#allocation2 + $0x8] sm:$0x1] %v33_v18  ;;  %v730_v23 = vld [vmem:[%s1266_s4] ss:$0 sm:$0xff]  ;;  %v99_v26 = vld [vmem:[#allocation2 + $0x8] sm:$0x2]  ;;  %vm1124_vm12 = vmand %vm96_vm6, %vm102_vm11 }
   0x9   :  { %v46_v27 = vmul.f32 %v820_v19, %v729_v16  ;;  %v47_v28 = vmul.f32 %v821_v20, %v729_v16  ;;  %v119_v29 = vmul.f32 %v824_v24, %v729_v16  ;;  %v120_v30 = vmul.f32 %v825_v25, %v729_v16  ;;  %v980_v33 = vld [vmem:[%s1263_s1 + $0x30] sm:$0xff]   ;;  %v981_v41 = vld [vmem:[%s1263_s1 + $0x78] sm:$0xff]   ;;  %vm1140_vm1 = vmor %vm25_vm2, %vm65_vm13 }
   0xa   :  { %v100_v31 = vsel %vm98_vm8, 0, %v99_v26  ;;  %v104_v46 = vld [vmem:[#allocation2 + $0x10] sm:$0x2]  ;;  %v982_v47 = vld [vmem:[%s1263_s1 + $0x38] sm:$0xff]   ;;  %vm1146_vm5 = vmand %vm87_vm9, %vm30_vm4  ;;  %vm658_vm8 = vcmask 1046532  }
   0xb   :  { %870 = vmatpush3.bf16.msra.mxu0 %v971_v5  ;;  %898 = vmatpush3.bf16.msra.mxu1 %v972_v6  ;;  %v55_v34 = vadd.f32 %v730_v23, %v46_v27  ;;  %v56_v35 = vadd.f32 %v730_v23, %v47_v28  ;;  %101 = vst [vmem:[#allocation2 + $0x8] sm:$0x2] %v100_v31  ;;  %v105_v50 = vsel %vm1124_vm12, 0, %v104_v46  ;;  %vm163_vm2 = vmand %vm162_vm10, %vm102_vm11  ;;  %v986_v11 = vld [vmem:[%s1263_s1 + $0x80] sm:$0xff]   ;;  %v993_v46 = vld [vmem:[%s1263_s1 + $0xa8] sm:$0xff]   ;;  %vm678_vm10 = vcmask 1045504  }
   0xc   :  { %871 = vmatprep.subr.bf16.mxu0 %v996_v0  ;;  %899 = vmatprep.subr.bf16.mxu1 %v996_v0  ;;  %v128_v36 = vadd.f32 %v730_v23, %v119_v29  ;;  %v129_v37 = vadd.f32 %v730_v23, %v120_v30  ;;  %106 = vst [vmem:[#allocation2 + $0x10] sm:$0x2] %v105_v50  ;;  %vm139_vm4 = vmor %vm97_vm7, %vm138_vm15  ;;  %v987_v29 = vld [vmem:[%s1263_s1 + $0x88] sm:$0xff]   ;;  %v995_v50 = vld [vmem:[%s1263_s1 + $0xb8] sm:$0xff]  }
   0xd   :  { %v57_v38 = vmax.f32 %v55_v34, 0.0  ;;  %v58_v39 = vmax.f32 %v56_v35, 0.0  ;;  %vm169_vm6 = vmand %vm168_vm14, %vm97_vm7  ;;  %vm487_vm7 = vcmask 1046528  }
   0xe   :  { %v130_v42 = vmax.f32 %v128_v36, 0.0  ;;  %v131_v43 = vmax.f32 %v129_v37, 0.0  ;;  %v89_v55 = vld [vmem:[#allocation2] sm:$0xf]  ;;  %v988_v37 = vld [vmem:[%s1263_s1 + $0x90] sm:$0xff]  }
   0xf   :  { %872 = vmatpush3.bf16.msra.mxu0 %v973_v7  ;;  %900 = vmatpush3.bf16.msra.mxu1 %v974_v8  ;;  %v809_v44 = vpack.c.bf16 %v57_v38, %v57_v38  ;;  %v810_v45 = vpack.c.bf16 %v58_v39, %v58_v39  ;;  %v93_v56 = vld [vmem:[#allocation2 + $0x8] sm:$0x1] }
  0x10   :  { %873 = vmatprep.subr.bf16.mxu0 %v996_v0  ;;  %901 = vmatprep.subr.bf16.mxu1 %v996_v0  ;;  %v811_v48 = vpack.c.bf16 %v130_v42, %v130_v42  ;;  %v812_v49 = vpack.c.bf16 %v131_v43, %v131_v43  ;;  %v991_v43 = vld [vmem:[%s1263_s1 + $0xa0] sm:$0xff]  }
  0x11   :  { %v68_v51 = vshrl.u32 %v809_v44, 16  ;;  %v71_v52 = vshll.u32 %v809_v44, 16  ;;  %v76_v53 = vshrl.u32 %v810_v45, 16  ;;  %v79_v54 = vshll.u32 %v810_v45, 16 }
  0x12   :  { %v141_v57 = vshrl.u32 %v811_v48, 16  ;;  %v144_v58 = vshll.u32 %v811_v48, 16  ;;  %v150_v59 = vshrl.u32 %v812_v49, 16  ;;  %v153_v60 = vshll.u32 %v812_v49, 16  ;;  %v164_v1 = vld [vmem:[#allocation2 + $0x8] sm:$0xe] }
  0x13   :  { %874 = vmatpush3.bf16.msra.mxu0 %v975_v9  ;;  %902 = vmatpush3.bf16.msra.mxu1 %v976_v10  ;;  %v70_v62 = vrot.slane %v68_v51, 7  ;;  %v78_v63 = vrot.slane %v76_v53, 7  ;;  %v170_v20 = vld [vmem:[#allocation2 + $0x10] sm:$0x3] }
  0x14   :  { %875 = vmatprep.subr.bf16.mxu0 %v996_v0  ;;  %903 = vmatprep.subr.bf16.mxu1 %v996_v0  ;;  %v143_v3 = vrot.slane %v141_v57, 6  ;;  %v146_v4 = vrot.slane %v144_v58, 7  ;;  %v152_v5 = vrot.slane %v150_v59, 6  ;;  %v155_v6 = vrot.slane %v153_v60, 7  ;;  %v994_v48 = vld [vmem:[%s1263_s1 + $0xb0] sm:$0xff]  }
  0x15   :  { %v73_v7 = vor.u32 %v71_v52, %v70_v62  ;;  %v74_v8 = vrot.slane %v70_v62, 4  ;;  %v81_v9 = vor.u32 %v79_v54, %v78_v63  ;;  %v83_v10 = vrot.slane %v78_v63, 4 }
  0x16   :  { %v147_v12 = vor.u32 %v146_v4, %v143_v3  ;;  %v156_v13 = vor.u32 %v155_v6, %v152_v5 }
  0x17   :  { %876 = vmatpush3.bf16.msra.mxu0 %v977_v17  ;;  %904 = vmatpush3.bf16.msra.mxu1 %v978_v22  ;;  %v82_v14 = vsel %vm1140_vm1, %v74_v8, %v81_v9  ;;  %v90_v15 = vsel %vm1146_vm5, %v73_v7, %v89_v55  ;;  %v94_v16 = vsel %vm1084_vm3, %v83_v10, %v93_v56  ;;  %vm225_vm3 = vsmask.f32 7424 }
  0x18   :  { %877 = vmatprep.subr.bf16.mxu0 %v996_v0  ;;  %905 = vmatprep.subr.bf16.mxu1 %v996_v0  ;;  %91 = vst [vmem:[#allocation2] sm:$0xf] %v90_v15  ;;  %92 = vst [vmem:[#allocation2 + $0x4] sm:$0xf] %v82_v14  ;;  %v148_v17 = vrot.slane %v147_v12, 4  ;;  %v165_v18 = vsel %vm163_vm2, %v147_v12, %v164_v1  ;;  %v158_v19 = vrot.slane %v156_v13, 4 }
  0x19   :  { %95 = vst [vmem:[#allocation2 + $0x8] sm:$0x1] %v94_v16  ;;  %166 = vst [vmem:[#allocation2 + $0x8] sm:$0xe] %v165_v18 }
  0x1a   :  { %v157_v21 = vsel %vm139_vm4, %v148_v17, %v156_v13  ;;  %v171_v22 = vsel %vm169_vm6, %v158_v19, %v170_v20 }
  0x1b   :  { %878 = vmatpush3.bf16.msra.mxu0 %v979_v32  ;;  %906 = vmatpush3.bf16.msra.mxu1 %v980_v33  ;;  %167 = vst [vmem:[#allocation2 + $0xc] sm:$0xf] %v157_v21  ;;  %172 = vst [vmem:[#allocation2 + $0x10] sm:$0x3] %v171_v22 }
  0x1c   :  { %879 = vmatprep.subr.bf16.mxu0 %v996_v0  ;;  %907 = vmatprep.subr.bf16.mxu1 %v996_v0 }
  0x1f   :  { %880 = vmatpush3.bf16.msra.mxu0 %v981_v41  ;;  %908 = vmatpush3.bf16.msra.mxu1 %v982_v47  ;;  %v173_v23 = vld [vmem:[#allocation2] sm:$0xf]  ;;  %v1164_v24 = vld [vmem:[#allocation2 + $0x4] sm:$0xf]  ;;  %v989_v41 = vld [vmem:[%s1263_s1 + $0x98] sm:$0xff]  }
  0x20   :  { %921 = vmatprep.subr.bf16.mxu0 %v996_v0  ;;  %949 = vmatprep.subr.bf16.mxu1 %v996_v0  ;;  %v755_v25 = vcombine.low %v173_v23, %v1164_v24  ;;  %v466_v49 = vld [vmem:[#allocation2] sm:$0xe]  ;;  %v800_v23 = vld [vmem:[%s1267_s2] ss:$0 sm:$0xff] }
  0x21   :  { %v791_v53 = vcombine.low %v466_v49, %v1164_v24 }
  0x22   :  { %v229_v26 = vshll.u32 %v755_v25, 16  ;;  %910 = vmatmul.mubr.bf16.vlgmr.msra.gmra.mrb[0].mxu1 %v755_v25  ;;  %v1170_v27 = vld [vmem:[#allocation2 + $0x8] sm:$0xff]   ;;  %v227_v28 = vshrl.u32 %v755_v25, 16  ;;  %v1177_v30 = vld [vmem:[#allocation2 + $0x10] ss:$0 sps:$4 sm:$0x33]  }
  0x23   :  { %957 = vmatpush3.bf16.msra.mxu1 %v986_v11  ;;  %913 = vmatprep.mubr.msk.bf16.mxu1 %vm997_vm0, %v996_v0  ;;  %v234_v32 = vshll.u32 %v1170_v27, 16  ;;  %v238_v35 = vshrl.u32 %v1170_v27, 16  ;;  %v242_v36 = vshll.u32 %v1177_v30, 16  ;;  %v992_v44 = vld [vmem:[#allocation2 + $0x10] ss:$0 sps:$4 sm:$0x11]  }
  0x24   :  { %v231_v31 = vrot.slane %v229_v26, 1  ;;  %950 = vmatprep.subr.bf16.mxu1 %v996_v0  ;;  %v246_v45 = vshrl.u32 %v1177_v30, 16  ;;  %v489_v51 = vrot.slane %v1170_v27, 1  ;;  %v491_v52 = vrot.slane %v1177_v30, 1 }
  0x25   :  { %v236_v34 = vrot.slane %v234_v32, 1  ;;  %v244_v40 = vrot.slane %v242_v36, 1  ;;  %v488_v55 = vrot.slane %v791_v53, 1 }
  0x26   :  { %v232_v33 = vor.u32 %v231_v31, %v227_v28  ;;  %v492_v54 = vsel %vm487_vm7, %v489_v51, %v491_v52 }
  0x27   :  { %958 = vmatpush3.bf16.msra.mxu1 %v987_v29  ;;  %v240_v39 = vor.u32 %v238_v35, %v236_v34  ;;  %v248_v47 = vor.u32 %v246_v45, %v244_v40  ;;  %v490_v56 = vsel %vm487_vm7, %v488_v55, %v489_v51 }
  0x28   :  { %v237_v38 = vsel %vm225_vm3, %v232_v33, %v236_v34  ;;  %951 = vmatprep.subr.bf16.mxu1 %v996_v0 }
  0x29   :  { %882 = vmatmul.mubr.bf16.vlgmr.msra.gmra.mrb[0].mxu0 %v237_v38  ;;  %v245_v42 = vsel %vm225_vm3, %v240_v39, %v244_v40 }
  0x2a   :  { %922 = vmatpush3.bf16.msra.mxu0 %v986_v11  ;;  %885 = vmatprep.mubr.msk.bf16.mxu0 %vm997_vm0, %v996_v0 }
  0x2b   :  { %923 = vmatprep.subr.bf16.mxu0 %v996_v0  ;;  %959 = vmatpush3.bf16.msra.mxu1 %v988_v37 }
  0x2c   :  { %952 = vmatprep.subr.bf16.mxu1 %v996_v0  ;;  %914 = vmatmul.mubr.bf16.gmra.mrb[4].mxu1 %v1170_v27 }
  0x2d   :  { %917 = vmatprep.mubr.msk.bf16.mxu1 %vm997_vm0, %v996_v0 }
  0x2e   :  { %924 = vmatpush3.bf16.msra.mxu0 %v987_v29 }
  0x2f   :  { %925 = vmatprep.subr.bf16.mxu0 %v996_v0  ;;  %960 = vmatpush3.bf16.msra.mxu1 %v989_v41 }
  0x30   :  { %953 = vmatprep.subr.bf16.mxu1 %v996_v0 }
  0x31   :  { %886 = vmatmul.mubr.bf16.gmra.mrb[4].mxu0 %v245_v42 }
  0x32   :  { %926 = vmatpush3.bf16.msra.mxu0 %v988_v37  ;;  %889 = vmatprep.mubr.msk.bf16.mxu0 %vm997_vm0, %v996_v0 }
  0x33   :  { %927 = vmatprep.subr.bf16.mxu0 %v996_v0  ;;  %961 = vmatpush3.bf16.msra.mxu1 %v991_v43 }
  0x34   :  { %954 = vmatprep.subr.bf16.mxu1 %v996_v0  ;;  %918 = vmatmul.mubr.bf16.gmra.mrb[8].mxu1 %v992_v44 }
  0x35   :  { %941 = vmatprep.mubr.msk.bf16.mxu1 %vm997_vm0, %v996_v0 }
  0x36   :  { %928 = vmatpush3.bf16.msra.mxu0 %v989_v41 }
  0x37   :  { %929 = vmatprep.subr.bf16.mxu0 %v996_v0  ;;  %962 = vmatpush3.bf16.msra.mxu1 %v993_v46 }
  0x38   :  { %955 = vmatprep.subr.bf16.mxu1 %v996_v0 }
  0x39   :  { %890 = vmatmul.mubr.bf16.gmra.mrb[8].mxu0 %v248_v47 }
  0x3a   :  { %930 = vmatpush3.bf16.msra.mxu0 %v991_v43  ;;  %937 = vmatprep.mubr.msk.bf16.mxu0 %vm997_vm0, %v996_v0 }
  0x3b   :  { %931 = vmatprep.subr.bf16.mxu0 %v996_v0  ;;  %963 = vmatpush3.bf16.msra.mxu1 %v994_v48 }
  0x3c   :  { %956 = vmatprep.subr.bf16.mxu1 %v996_v0 }
  0x3e   :  { %932 = vmatpush3.bf16.msra.mxu0 %v993_v46 }
  0x3f   :  { %933 = vmatprep.subr.bf16.mxu0 %v996_v0  ;;  %964 = vmatpush3.bf16.msra.mxu1 %v995_v50 }
  0x42   :  { %934 = vmatpush3.bf16.msra.mxu0 %v994_v48  ;;  %942 = vmatmul.mubr.bf16.vlgmr.msra.gmra.mrb[12].mxu1 %v492_v54 }
  0x43   :  { %935 = vmatprep.subr.bf16.mxu0 %v996_v0  ;;  %945 = vmatprep.mubr.msk.bf16.mxu1 %vm997_vm0, %v996_v0  ;;  %vm657_vm0 = vcmask 1042432  }
  0x44   :  { %vm1236_vm9 = vmor %vm657_vm0, %vm658_vm8 }
  0x46   :  { %936 = vmatpush3.bf16.msra.mxu0 %v995_v50 }
  0x49   :  { %938 = vmatmul.mubr.bf16.vlgmr.msra.gmra.mrb[12].mxu0 %v490_v56 }
  0x4a   :  { %946 = vmatmul.mubr.bf16.gmra.mrb[16].mxu1 %v491_v52 }
  0xf5   :  { %v444_v57 = vpop.f32.mrb[0].mxu1 }
  0xf6   :  { %v911_v58 = vpop.f32.mrb[1].mxu1 }
  0xf7   :  { %v447_v59 = vpop.f32.mrb[2].mxu1 }
  0xf8   :  { %v912_v60 = vpop.f32.mrb[3].mxu1 }
  0xfc   :  { %v334_v61 = vpop.f32.mrb[0].mxu0 }
  0xfd   :  { %v445_v62 = vadd.f32 %v444_v57, %v334_v61  ;;  %v883_v63 = vpop.f32.mrb[1].mxu0 }
  0xfe   :  { %v337_v1 = vpop.f32.mrb[2].mxu0 }
  0xff   :  { %v448_v2 = vadd.f32 %v447_v59, %v337_v1  ;;  %v884_v3 = vpop.f32.mrb[3].mxu0  ;;  %v452_v4 = vpop.f32.mrb[4].mxu1 }
 0x100   :  { %v915_v5 = vpop.f32.mrb[5].mxu1 }
 0x101   :  { %v455_v6 = vpop.f32.mrb[6].mxu1 }
 0x102   :  { %v916_v7 = vpop.f32.mrb[7].mxu1 }
 0x104   :  { %v342_v8 = vpop.f32.mrb[4].mxu0 }
 0x105   :  { %v453_v0 = vadd.f32 %v452_v4, %v342_v8  ;;  %v887_v9 = vpop.f32.mrb[5].mxu0 }
 0x106   :  { %v345_v10 = vpop.f32.mrb[6].mxu0 }
 0x107   :  { %v456_v12 = vadd.f32 %v455_v6, %v345_v10  ;;  %v460_v13 = vpop.f32.mrb[8].mxu1  ;;  %v888_v14 = vpop.f32.mrb[7].mxu0 }
 0x108   :  { %v919_v15 = vpop.f32.mrb[9].mxu1 }
 0x109   :  { %v463_v16 = vpop.f32.mrb[10].mxu1 }
 0x10a   :  { %v920_v17 = vpop.f32.mrb[11].mxu1 }
 0x10c   :  { %v350_v18 = vpop.f32.mrb[8].mxu0 }
 0x10d   :  { %v461_v19 = vadd.f32 %v460_v13, %v350_v18  ;;  %v891_v20 = vpop.f32.mrb[9].mxu0 }
 0x10e   :  { %v353_v21 = vpop.f32.mrb[10].mxu0 }
 0x10f   :  { %v892_v22 = vpop.f32.mrb[11].mxu0 }
 0x115   :  { %v586_v24 = vpop.f32.mrb[12].mxu1 }
 0x116   :  { %v602_v11 = vadd.f32 %v586_v24, %v453_v0  ;;  %v943_v25 = vpop.f32.mrb[13].mxu1 }
 0x117   :  { %v589_v26 = vpop.f32.mrb[14].mxu1 }
 0x118   :  { %v614_v27 = vadd.f32 %v800_v23, %v602_v11  ;;  %v603_v28 = vadd.f32 %v589_v26, %v456_v12  ;;  %v944_v29 = vpop.f32.mrb[15].mxu1 }
 0x11a   :  { %v815_v30 = vpack.c.bf16 %v614_v27, %v614_v27  ;;  %v615_v31 = vadd.f32 %v800_v23, %v603_v28 }
 0x11c   :  { %v578_v32 = vpop.f32.mrb[12].mxu0  ;;  %v647_v33 = vpack.c.bf16 %v615_v31, %v614_v27  ;;  %v816_v34 = vpack.c.bf16 %v615_v31, %v615_v31  ;;  %v806_v39 = vrot.slane %v815_v30, 9 }
 0x11d   :  { %v600_v35 = vadd.f32 %v578_v32, %v445_v62  ;;  %v939_v36 = vpop.f32.mrb[13].mxu0  ;;  %v594_v38 = vpop.f32.mrb[16].mxu1 }
 0x11e   :  { %v581_v40 = vpop.f32.mrb[14].mxu0  ;;  %v662_v41 = vrot.slane %v816_v34, 5  ;;  %v604_v42 = vadd.f32 %v594_v38, %v461_v19  ;;  %v947_v43 = vpop.f32.mrb[17].mxu1  ;;  %v672_v48 = vunpack.c.l.bf16 %v647_v33  ;;  %v673_v49 = vunpack.c.h.bf16 %v647_v33 }
 0x11f   :  { %v601_v44 = vadd.f32 %v581_v40, %v448_v2  ;;  %v940_v45 = vpop.f32.mrb[15].mxu0  ;;  %v597_v46 = vpop.f32.mrb[18].mxu1  ;;  %v612_v51 = vadd.f32 %v800_v23, %v600_v35 }
 0x120   :  { %v663_v47 = vsel %vm1236_vm9, %v806_v39, %v662_v41  ;;  %v948_v50 = vpop.f32.mrb[19].mxu1  ;;  %v616_v53 = vadd.f32 %v800_v23, %v604_v42  ;;  %v694_v56 = vmul.f32 %v672_v48, %v672_v48  ;;  %v695_v57 = vmul.f32 %v673_v49, %v673_v49 }
 0x121   :  { %v613_v52 = vadd.f32 %v800_v23, %v601_v44  ;;  %807 = vst [vmem:[%s1268_s5 + $0x8] sm:$0xf] %v663_v47  ;;  %v664_v60 = vrot.slane %v662_v41, 4  ;;  %v679_v62 = vrot.slane %v672_v48, 2  ;;  %v680_v63 = vrot.slane %v673_v49, 2 }
 0x122   :  { %v648_v55 = vpack.c.bf16 %v616_v53, %v616_v53  ;;  %v700_v6 = vrot.slane %v694_v56, 2  ;;  %v701_v7 = vrot.slane %v695_v57, 2 }
 0x123   :  { %v617_v54 = vpack.c.bf16 %v613_v52, %v612_v51  ;;  %v681_v12 = vsel %vm678_vm10, %v679_v62, %v680_v63 }
 0x124   :  { %v665_v61 = vrot.slane %v648_v55, 5  ;;  %v674_v1 = vunpack.c.l.bf16 %v648_v55  ;;  %v702_v18 = vsel %vm678_vm10, %v700_v6, %v701_v7 }
 0x125   :  { %830 = vst [vmem:[%s1268_s5] sm:$0xff] %v617_v54   ;;  %v627_v58 = vunpack.c.l.bf16 %v617_v54  ;;  %v628_v59 = vunpack.c.h.bf16 %v617_v54 }
 0x126   :  { %v666_v5 = vsel %vm1236_vm9, %v664_v60, %v665_v61  ;;  %v682_v8 = vrot.slane %v674_v1, 2  ;;  %v696_v0 = vmul.f32 %v674_v1, %v674_v1 }
 0x127   :  { %v629_v2 = vadd.f32 %v628_v59, %v627_v58  ;;  %v637_v3 = vmul.f32 %v627_v58, %v627_v58  ;;  %v638_v4 = vmul.f32 %v628_v59, %v628_v59  ;;  %808 = vst [vmem:[%s1268_s5 + $0xc] sm:$0xf] %v666_v5 }
 0x128   :  { %v683_v13 = vsel %vm678_vm10, %v680_v63, %v682_v8  ;;  %v703_v14 = vrot.slane %v696_v0, 2 }
 0x129   :  { %v630_v9 = vrot.slane %v629_v2, 4  ;;  %v639_v10 = vadd.f32 %v638_v4, %v637_v3  ;;  %v686_v17 = vadd.f32 %v683_v13, %v681_v12 }
 0x12a   :  { %v704_v19 = vsel %vm678_vm10, %v701_v7, %v703_v14 }
 0x12b   :  { %v631_v15 = vadd.f32 %v630_v9, %v629_v2  ;;  %v640_v16 = vrot.slane %v639_v10, 4  ;;  %v687_v22 = vrot.slane %v686_v17, 4  ;;  %v707_v23 = vadd.f32 %v704_v19, %v702_v18 }
 0x12d   :  { %v632_v20 = vrot.slane %v631_v15, 2  ;;  %v641_v21 = vadd.f32 %v640_v16, %v639_v10  ;;  %v688_v25 = vadd.f32 %v687_v22, %v686_v17  ;;  %v708_v26 = vrot.slane %v707_v23, 4 }
 0x12f   :  { %v633_v24 = vadd.f32 %v632_v20, %v631_v15  ;;  %v642_v11 = vrot.slane %v641_v21, 2  ;;  %v689_v28 = vrot.slane %v688_v25, 2  ;;  %v709_v29 = vadd.f32 %v708_v26, %v707_v23 }
 0x131   :  { %v643_v27 = vadd.f32 %v642_v11, %v641_v21  ;;  %v634_v30 = vrot.slane %v633_v24, 1  ;;  %v690_v31 = vadd.f32 %v689_v28, %v688_v25  ;;  %v710_v32 = vrot.slane %v709_v29, 2 }
 0x133   :  { %v644_v33 = vrot.slane %v643_v27, 1  ;;  %v691_v34 = vrot.slane %v690_v31, 1  ;;  %v711_v35 = vadd.f32 %v710_v32, %v709_v29  ;;  %v635_v36 = vadd.f32 %v634_v30, %v633_v24 }
 0x135   :  { %v692_v37 = vadd.f32 %v691_v34, %v690_v31  ;;  %v712_v38 = vrot.slane %v711_v35, 1  ;;  %v645_v39 = vadd.f32 %v644_v33, %v643_v27 }
 0x137   :  { %v693_v40 = vadd.f32 %v692_v37, %v635_v36  ;;  %v713_v41 = vadd.f32 %v712_v38, %v711_v35 }
 0x139   :  { %v714_v42 = vadd.f32 %v713_v41, %v645_v39  ;;  %715 = vst [vmem:[%s1269_s6] sm:$0x1] %v693_v40 }
 0x13b   :  { %716 = vst [vmem:[%s1270_s7] sm:$0x1] %v714_v42 }

// kernel: vgg_block_forward.5
= control target key start
LH: loop header
LB: loop body
LE: loop exit
PB: predicated region body
PF: predicated region fallthrough
CT: control target
= control target key end

     0   :  { %s324_s12 = smov 0   ;;  %s341_s0 = inlined_call_operand.vmem [shape: bf16[2,16,128], index: 0, kind: input, shape index: {}]   ;;  %s342_s1 = inlined_call_operand.vmem [shape: f32[1,128], index: 1, kind: input, shape index: {}]   ;;  %s343_s2 = inlined_call_operand.vmem [shape: f32[1,128], index: 2, kind: input, shape index: {}]   ;;  %s344_s3 = inlined_call_operand.vmem [shape: bf16[2,16,128], index: 3, kind: output, shape index: {}]  }
   0x1 LB: > { %s260_s13 = sadd.s32 4294967295, %s302_s12   ;;  %p264_p0 = scmp.ge.s32.totalorder %s302_s12, 1  ;;  %s302_s12 = sphi %s324_s12, %s13_s12  }
   0x2   : > { %p137_p1 = scmp.lt.s32.totalorder %s302_s12, 3 }
   0x4   : > { %p138_p2 = pnand %p264_p0, %p137_p1 }
   0x5   : > { %p161_p3 = scmp.lt.s32.totalorder (!%p138_p2), %s260_s13, 1  ;;  %v269_v1 = vld [vmem:[%s342_s1] ss:$0 sm:$0xff] (!%p138_p2) }
   0x6   : > { %141 = sbr.rel (%p138_p2) target bundleno = 28 (0x1c), region = 32  ;;  %v270_v4 = vld [vmem:[%s343_s2] ss:$0 sm:$0xff] (!%p138_p2) }
   0xd   : > { %s346_s13 = smov (!%p161_p3, %s260_s13), 1 }
   0xe   : > { %s275_s14 = sshll.u32 %s346_s13, 3 }
   0xf   : > { %s165_s17 = scalar_lea.vmem %s341_s0, %s275_s14  ;;  %s170_s24 = scalar_lea.vmem %s344_s3, %s275_s14 }
  0x10   : > { %v280_v0 = vld [vmem:[%s165_s17] sm:$0xff]  }
  0x11   : > { %v281_v2 = vunpack.c.l.bf16 %v280_v0  ;;  %v282_v3 = vunpack.c.h.bf16 %v280_v0 }
  0x13   : > { %v183_v5 = vmul.f32 %v281_v2, %v269_v1  ;;  %v184_v6 = vmul.f32 %v282_v3, %v269_v1 }
  0x15   : > { %v191_v7 = vadd.f32 %v270_v4, %v183_v5  ;;  %v192_v8 = vadd.f32 %v270_v4, %v184_v6 }
  0x17   : > { %v193_v9 = vmax.f32 %v191_v7, 0.0  ;;  %v194_v10 = vmax.f32 %v192_v8, 0.0 }
  0x19   : > { %v286_v11 = vpack.c.bf16 %v194_v10, %v193_v9 }
  0x1b   : > { %287 = vst [vmem:[%s170_s24] sm:$0xff] %v286_v11  }
  0x1c PF: > { %s13_s12 = sadd.s32 1, %s302_s12  }
  0x1d   : > { %p10_p4 = scmp.ge.s32.totalorder %s13_s12, 4  }
  0x1f   :  { %12 = sbr.rel (!%p10_p4) target bundleno = 1 (0x1), region = 62 }

</bundles_post_ra>
